<compile_context>
chip_gen: v7x
topology: tpu7x:2x2x1
jax: 0.10.0
libtpu: 0.0.40
codegen_flags: <defaults>
</compile_context>

<pallas_src>
import functools

import jax
import jax.numpy as jnp
import numpy as np
from jax.experimental import pallas as pl
from jax.experimental.pallas import tpu as pltpu

BLOCK = 128  # gate block size (hard-coded in the PyTorch module)


def _gmv_kernel(x_ref, w_ref, g_ref, e_ref, y_ref, *, ns, kb):
    """One (tm, tn) output tile; full-K contraction per 128-wide output block.

    x_ref: (tm, K)      bf16
    w_ref: (K, tn)      bf16
    g_ref: (tm, NS*KB)  f32    column index = nn*KB + kk
    e_ref: (KB, K)      bf16   0/1 expansion: e[kk, kk*128:(kk+1)*128] = 1
    y_ref: (tm, tn)     bf16
    """
    for nn in range(ns):  # short static loop (NS <= 18 with default tiles)
        # Exact k-block -> k-element gate broadcast done on the MXU (tiny K=KB dot);
        # keeps XLU lane-splats off the critical path.
        g_nn = g_ref[:, nn * kb:(nn + 1) * kb].astype(jnp.bfloat16)      # (tm, KB)
        ge = jnp.dot(
            g_nn, e_ref[...], preferred_element_type=jnp.float32
        ).astype(jnp.bfloat16)                                           # (tm, K)
        xg = x_ref[...] * ge                                             # (tm, K) bf16
        nl = nn * BLOCK
        # One full-K MXU dot per 128-wide output block, f32 accumulation inside the
        # MXU; the output block is written exactly once (no RMW on y_ref).
        y_ref[:, nl:nl + BLOCK] = jnp.dot(
            xg, w_ref[:, nl:nl + BLOCK], preferred_element_type=jnp.float32
        ).astype(y_ref.dtype)


def _pick_tile(requested, total, quantum):
    """Largest multiple of `quantum` that is <= min(requested, total) and divides total."""
    t = min(requested, total)
    t = (t // quantum) * quantum
    while t > 0 and total % t:
        t -= quantum
    assert t > 0, (requested, total, quantum)
    return t


@functools.partial(jax.jit, static_argnames=("tm", "tn"))
def gmv(X, W, G, tm=256, tn=2304):
    batch, dim_in = X.shape
    dim_in_w, dim_out = W.shape
    assert dim_in == dim_in_w
    assert dim_in % BLOCK == 0 and dim_out % BLOCK == 0
    assert batch % 8 == 0
    KB = dim_in // BLOCK
    NB = dim_out // BLOCK
    assert G.shape == (batch, KB, NB)

    tm = _pick_tile(tm, batch, 8)        # batch tile (sublane aligned)
    tn = _pick_tile(tn, dim_out, BLOCK)  # output tile (multiple of gate block)
    MI = batch // tm
    NJ = dim_out // tn
    NS = tn // BLOCK

    # bf16 MXU inputs (f32 accumulation in-kernel). Halves X/W HBM traffic.
    Xb = X.astype(jnp.bfloat16)
    Wb = W.astype(jnp.bfloat16)

    # Gate layout plumbing (tiny, done once in XLA):
    #   G2[j*batch + b, nn*KB + kk] = G[b, kk, j*NS + nn]
    # so the kernel only ever does static slices of its (tm, NS*KB) gate block.
    G2 = (
        G.reshape(batch, KB, NJ, NS)
        .transpose(2, 0, 3, 1)
        .reshape(NJ * batch, NS * KB)
        .astype(jnp.float32)
    )

    # Constant 0/1 expansion matrix: E[kk, k] = (k // BLOCK == kk).  Used in-kernel
    # to broadcast the per-k-block gate to per-k-element on the MXU (exact).
    E = (
        jnp.arange(dim_in)[None, :] // BLOCK == jnp.arange(KB)[:, None]
    ).astype(jnp.bfloat16)

    kernel = functools.partial(_gmv_kernel, ns=NS, kb=KB)

    # Grid: j (output panel) outer, i (batch tile) inner -> the (dim_in, tn) W panel
    # is DMA'd once per j (W read exactly once overall); X streams NJ times.
    grid = (NJ, MI)

    return pl.pallas_call(
        kernel,
        out_shape=jax.ShapeDtypeStruct((batch, dim_out), jnp.bfloat16),
        grid_spec=pltpu.PrefetchScalarGridSpec(
            num_scalar_prefetch=0,
            grid=grid,
            in_specs=[
                pl.BlockSpec((tm, dim_in), lambda j, i: (i, 0)),              # X tile (full K)
                pl.BlockSpec((dim_in, tn), lambda j, i: (0, j)),              # W panel (full K)
                pl.BlockSpec((tm, NS * KB), lambda j, i, _MI=MI: (j * _MI + i, 0)),  # gate slab
                pl.BlockSpec((KB, dim_in), lambda j, i: (0, 0)),              # expansion matrix
            ],
            out_specs=pl.BlockSpec((tm, tn), lambda j, i: (i, j)),
        ),
        compiler_params=pltpu.CompilerParams(
            dimension_semantics=("parallel", "parallel"),
            vmem_limit_bytes=48 * 1024 * 1024,  # ~21 MiB used at tn=2304; < v7x 64 MiB
        ),
    )(Xb, Wb, G2, E)


def test_gradient_forward(X, W, G, **tiles):
    """Equivalent of TestGradient.forward(): Y = GMV(X, W, G); return sum(Y)**2."""
    Y = gmv(X, W, G, **tiles)                 # hot path: Pallas kernel (bf16 output)
    s = jnp.sum(Y, dtype=jnp.float32)         # f32 accumulation for the scalar glue
    return s * s, Y


def _reference(X, W, G):
    Gexp = jnp.repeat(jnp.repeat(G, BLOCK, axis=1), BLOCK, axis=2)
    Y = jnp.einsum("bk,kn,bkn->bn", X, W, Gexp)
    s = jnp.sum(Y)
    return s * s, Y


# TODO(synk): GMV.apply's custom autograd backward is not implemented (forward only).

if __name__ == "__main__":
    # Small shapes consistent with the module (original: 1536 x 1536 x 4608, block 128).
    batch, dim_in, dim_out = 256, 384, 512
    key = jax.random.PRNGKey(0)
    kx, kw, kg = jax.random.split(key, 3)

    X = jax.random.normal(kx, (batch, dim_in), dtype=jnp.float32)
    W = jax.random.normal(kw, (dim_in, dim_out), dtype=jnp.float32)
    G = jax.random.normal(
        kg, (batch, dim_in // BLOCK, dim_out // BLOCK), dtype=jnp.float32
    )

    # Small tiles so the test exercises a multi-step grid (MI=2, NJ=2, NS=2, KB=3).
    out, Y = test_gradient_forward(X, W, G, tm=128, tn=256)
    out = jax.block_until_ready(out)
    Yf = np.asarray(jax.block_until_ready(Y)).astype(np.float32)

    # Correctness vs pure-f32 reference. Kernel uses bf16 MXU inputs / bf16 output
    # with f32 accumulation, so use a norm-based check plus a scale-aware
    # elementwise atol (unit-variance data, K=384 accumulation).
    ref_out, ref_Y = _reference(X, W, G)
    ref_Y = np.asarray(ref_Y)

    rel_err = np.linalg.norm(Yf - ref_Y) / np.linalg.norm(ref_Y)
    assert rel_err < 2e-2, f"relative Frobenius error too large: {rel_err}"
    np.testing.assert_allclose(Yf, ref_Y, rtol=2e-2, atol=0.5)
    assert np.isfinite(float(out))

    print("KERNEL_OK")
</pallas_src>

<mosaic_0001>
module attributes {stable_mosaic.version = 11 : i64} {
  func.func @_gmv_kernel(%arg0: i32, %arg1: i32, %arg2: memref<128x384xbf16, #tpu.memory_space<vmem>>, %arg3: memref<384x256xbf16, #tpu.memory_space<vmem>>, %arg4: memref<128x6xf32, #tpu.memory_space<vmem>>, %arg5: memref<3x384xbf16, #tpu.memory_space<vmem>>, %arg6: memref<128x256xbf16, #tpu.memory_space<vmem>>) attributes {dimension_semantics = [#tpu.dimension_semantics<parallel>, #tpu.dimension_semantics<parallel>], iteration_bounds = array<i64: 2, 2>, scalar_prefetch = 0 : i64, scratch_operands = 0 : i64, tpu.core_type = #tpu.core_type<tc>, window_params = [{transform_indices = @transform_0, window_bounds = array<i64: 128, 384>}, {transform_indices = @transform_1, window_bounds = array<i64: 384, 256>}, {transform_indices = @transform_2, window_bounds = array<i64: 128, 6>}, {pipeline_mode = #tpu.pipeline_mode<synchronous>, transform_indices = @transform_3, window_bounds = array<i64: 3, 384>}, {transform_indices = @transform_4, window_bounds = array<i64: 128, 256>}]} {
    %c0 = arith.constant 0 : index
    %c0_0 = arith.constant 0 : index
    %0 = vector.load %arg4[%c0, %c0_0] : memref<128x6xf32, #tpu.memory_space<vmem>>, vector<128x3xf32>
    %1 = arith.truncf %0 : vector<128x3xf32> to vector<128x3xbf16>
    %c0_1 = arith.constant 0 : index
    %c0_2 = arith.constant 0 : index
    %2 = vector.load %arg5[%c0_1, %c0_2] : memref<3x384xbf16, #tpu.memory_space<vmem>>, vector<3x384xbf16>
    %cst = arith.constant dense<0.000000e+00> : vector<128x384xf32>
    %3 = tpu.matmul %1, %2, %cst {dimension_numbers = #tpu.dot_dimension_numbers<[1], [0], [0], [1], [0, 0, 1, 1], [], []>} : vector<128x3xbf16>, vector<3x384xbf16>, vector<128x384xf32> -> vector<128x384xf32>
    %4 = arith.truncf %3 : vector<128x384xf32> to vector<128x384xbf16>
    %c0_3 = arith.constant 0 : index
    %c0_4 = arith.constant 0 : index
    %5 = vector.load %arg2[%c0_3, %c0_4] : memref<128x384xbf16, #tpu.memory_space<vmem>>, vector<128x384xbf16>
    %6 = arith.mulf %5, %4 : vector<128x384xbf16>
    %c0_5 = arith.constant 0 : index
    %c0_6 = arith.constant 0 : index
    %7 = vector.load %arg3[%c0_5, %c0_6] : memref<384x256xbf16, #tpu.memory_space<vmem>>, vector<384x128xbf16>
    %cst_7 = arith.constant dense<0.000000e+00> : vector<128x128xf32>
    %8 = tpu.matmul %6, %7, %cst_7 {dimension_numbers = #tpu.dot_dimension_numbers<[1], [0], [0], [1], [0, 0, 1, 1], [], []>} : vector<128x384xbf16>, vector<384x128xbf16>, vector<128x128xf32> -> vector<128x128xf32>
    %9 = arith.truncf %8 : vector<128x128xf32> to vector<128x128xbf16>
    %c0_8 = arith.constant 0 : index
    %c0_9 = arith.constant 0 : index
    %10 = vector.load %arg6[%c0_8, %c0_9] : memref<128x256xbf16, #tpu.memory_space<vmem>>, vector<128x128xbf16>
    tpu.vector_store %arg6[%c0_8, %c0_9], %9 {strides = array<i32>} : memref<128x256xbf16, #tpu.memory_space<vmem>>, vector<128x128xbf16>,
    %c0_10 = arith.constant 0 : index
    %c3 = arith.constant 3 : index
    %11 = vector.load %arg4[%c0_10, %c3] : memref<128x6xf32, #tpu.memory_space<vmem>>, vector<128x3xf32>
    %12 = arith.truncf %11 : vector<128x3xf32> to vector<128x3xbf16>
    %c0_11 = arith.constant 0 : index
    %c0_12 = arith.constant 0 : index
    %13 = vector.load %arg5[%c0_11, %c0_12] : memref<3x384xbf16, #tpu.memory_space<vmem>>, vector<3x384xbf16>
    %cst_13 = arith.constant dense<0.000000e+00> : vector<128x384xf32>
    %14 = tpu.matmul %12, %13, %cst_13 {dimension_numbers = #tpu.dot_dimension_numbers<[1], [0], [0], [1], [0, 0, 1, 1], [], []>} : vector<128x3xbf16>, vector<3x384xbf16>, vector<128x384xf32> -> vector<128x384xf32>
    %15 = arith.truncf %14 : vector<128x384xf32> to vector<128x384xbf16>
    %c0_14 = arith.constant 0 : index
    %c0_15 = arith.constant 0 : index
    %16 = vector.load %arg2[%c0_14, %c0_15] : memref<128x384xbf16, #tpu.memory_space<vmem>>, vector<128x384xbf16>
    %17 = arith.mulf %16, %15 : vector<128x384xbf16>
    %c0_16 = arith.constant 0 : index
    %c128 = arith.constant 128 : index
    %18 = vector.load %arg3[%c0_16, %c128] : memref<384x256xbf16, #tpu.memory_space<vmem>>, vector<384x128xbf16>
    %cst_17 = arith.constant dense<0.000000e+00> : vector<128x128xf32>
    %19 = tpu.matmul %17, %18, %cst_17 {dimension_numbers = #tpu.dot_dimension_numbers<[1], [0], [0], [1], [0, 0, 1, 1], [], []>} : vector<128x384xbf16>, vector<384x128xbf16>, vector<128x128xf32> -> vector<128x128xf32>
    %20 = arith.truncf %19 : vector<128x128xf32> to vector<128x128xbf16>
    %c0_18 = arith.constant 0 : index
    %c128_19 = arith.constant 128 : index
    %21 = vector.load %arg6[%c0_18, %c128_19] : memref<128x256xbf16, #tpu.memory_space<vmem>>, vector<128x128xbf16>
    tpu.vector_store %arg6[%c0_18, %c128_19], %20 {strides = array<i32>} : memref<128x256xbf16, #tpu.memory_space<vmem>>, vector<128x128xbf16>,
    return
  }
  func.func @transform_0(%arg0: i32, %arg1: i32) -> (i32, i32) {
    %c0_i32 = arith.constant 0 : i32
    %c0_i32_0 = arith.constant 0 : i32
    return %arg1, %c0_i32 : i32, i32
  }
  func.func @transform_1(%arg0: i32, %arg1: i32) -> (i32, i32) {
    %c0_i32 = arith.constant 0 : i32
    %c0_i32_0 = arith.constant 0 : i32
    return %c0_i32, %arg0 : i32, i32
  }
  func.func @transform_2(%arg0: i32, %arg1: i32) -> (i32, i32) {
    %c2_i32 = arith.constant 2 : i32
    %0 = arith.muli %arg0, %c2_i32 : i32
    %1 = arith.addi %0, %arg1 : i32
    %c0_i32 = arith.constant 0 : i32
    %c0_i32_0 = arith.constant 0 : i32
    return %1, %c0_i32 : i32, i32
  }
  func.func @transform_3(%arg0: i32, %arg1: i32) -> (i32, i32) {
    %c0_i32 = arith.constant 0 : i32
    %c0_i32_0 = arith.constant 0 : i32
    %c0_i32_1 = arith.constant 0 : i32
    return %c0_i32, %c0_i32_0 : i32, i32
  }
  func.func @transform_4(%arg0: i32, %arg1: i32) -> (i32, i32) {
    %c0_i32 = arith.constant 0 : i32
    return %arg1, %arg0 : i32, i32
  }
}

</mosaic_0001>

<bundles_post_ra>
// kernel: gmv.1
= control target key start
LH: loop header
LB: loop body
LE: loop exit
PB: predicated region body
PF: predicated region fallthrough
CT: control target
= control target key end

     0   :  { %9 = vsyncpa [#allocation4], 0  ;;  %s4370_s0 = inlined_call_operand.vmem [shape: bf16[256,384], index: 0, kind: input, shape index: {}]   ;;  %s4371_s1 = inlined_call_operand.vmem [shape: bf16[384,512], index: 1, kind: input, shape index: {}]   ;;  %s4372_s2 = inlined_call_operand.vmem [shape: f32[512,6], index: 2, kind: input, shape index: {}]   ;;  %s4373_s3 = inlined_call_operand.vmem [shape: bf16[3,384], index: 3, kind: input, shape index: {}]   ;;  %s4374_s4 = inlined_call_operand.hbm [shape: bf16[256,512], index: 4, kind: output, shape index: {}]  }
   0x1   :  { %11 = vsyncpa [#allocation4 + $0x1], 0  ;;  %s3770_s15 = smov 0   ;;  %s3772_s16 = smov 0  }
   0x2   :  { %s3774_s17 = smov 0   ;;  %s3776_s18 = smov 0  }
   0x3   :  { %s3778_s19 = smov 0   ;;  %s3780_s20 = smov 0  }
   0x4   :  { %s3782_s21 = smov 0   ;;  %s3784_s22 = smov 0  }
   0x5   :  { %s3786_s23 = smov 0   ;;  %s3788_s24 = smov 0  }
   0x6 LB: > { %s2856_s25 = sadd.s32 4294967295, %s3735_s24   ;;  %s2857_s26 = sadd.s32 4294967294, %s3735_s24   ;;  %s3735_s24 = sphi %s3788_s24, %s17_s24   ;;  %s3731_s23 = sphi %s3786_s23, %s4386_s23   ;;  %s3727_s22 = sphi %s3784_s22, %s4385_s22   ;;  %s3723_s21 = sphi %s3782_s21, %s4384_s21   ;;  %s3719_s20 = sphi %s3780_s20, %s4383_s20   ;;  %s3715_s19 = sphi %s3778_s19, %s4382_s19   ;;  %s3711_s18 = sphi %s3776_s18, %s4381_s18   ;;  %s3707_s17 = sphi %s3774_s17, %s4380_s17   ;;  %s3703_s16 = sphi %s3772_s16, %s4379_s16   ;;  %s3699_s15 = sphi %s3770_s15, %s4378_s15  }
   0x7   : > { %s26_s27 = sadd.s32 1, %s3727_s22  ;;  %s29_s28 = sadd.s32 1, %s3731_s23 }
   0x8   : > { %p27_p0 = scmp.ge.s32.totalorder %s26_s27, 2  ;;  %s62_s29 = sadd.s32 1, %s3715_s19 }
   0x9   : > { %p69_p1 = scmp.ne.s32.totalorder %s3715_s19, %s3711_s18  ;;  %p70_p2 = scmp.eq.s32.totalorder %s3735_s24, 0 }
   0xa   : > { %s4388_s27 = smov (%p27_p0, %s26_s27), 0  ;;  %s4390_s28 = smov (!%p27_p0, %s29_s28), %s3731_s23 }
   0xb   : > { %p3831_p3 = por %p70_p2, %p69_p1  ;;  %s136_s5 = ssub.s32 %s3727_s22, %s4388_s27 }
   0xc   : > { %p31_p4 = scmp.ge.s32.totalorder %s4390_s28, 2  ;;  %s141_s6 = sadd.s32 1, %s3707_s17 }
   0xd   : > { %p151_p5 = scmp.ne.s32.totalorder %s3707_s17, %s3703_s16  ;;  %p152_p6 = scmp.eq.s32.totalorder %s2856_s25, 3 }
   0xe   : > { %s4392_s28 = smov (%p31_p4, %s4390_s28), 0  ;;  %p157_p8 = scmp.ne.s32.totalorder %s3703_s16, %s3699_s15 }
   0xf   : > { %p3842_p7 = por %p152_p6, %p151_p5  ;;  %s59_s8 = ssub.s32 %s3731_s23, %s4392_s28 }
  0x10   : > { %p158_p9 = scmp.eq.s32.totalorder %s2857_s26, 3  ;;  %p60_p10 = scmp.eq.s32.totalorder %s59_s8, 0 }
  0x11   : > { %s138_s9 = sor.u32 %s136_s5, %s59_s8  ;;  %p2861_p13 = scmp.ge.s32.totalorder %s3735_s24, 4 }
  0x12   : > { %p139_p11 = scmp.eq.s32.totalorder %s138_s9, 0  ;;  %p3850_p12 = por %p158_p9, %p157_p8 }
  0x13   : > { %s3855_s11 = scalar_select %p60_p10, %s3715_s19, %s62_s29  }
  0x14   : > { %s3858_s12 = scalar_select %p139_p11, %s3707_s17, %s141_s6  }
  0x15   : > { %177 = sbr.rel (%p2861_p13) target bundleno = 56 (0x38), region = 20 }
  0x1c   : > { %190 = sbr.rel (!%p3831_p3) target bundleno = 56 (0x38), region = 28  ;;  %s192_s13 = sand.u32 (%p3831_p3), 1, %s3715_s19  }
  0x1d   : > { %s3102_s14 = sshll.u32 (%p3831_p3), %s3731_s23, 3  ;;  %s3478_s25 = smul.u32 (%p3831_p3), 384, %s192_s13 }
  0x1e   : > { %s3868_s8 = scalar_lea.vmem (%p3831_p3), %s4371_s1, %s3102_s14 }
  0x1f   : > { %v319_v0 = vld [vmem:[%s3868_s8] sm:$0xff] (%p3831_p3)  ;;  %v321_v1 = vld [vmem:[%s3868_s8 + $0x10] sm:$0xff] (%p3831_p3)  ;;  %s3876_s29 = scalar_lea.vmem (%p3831_p3), [#allocation2], %s3478_s25 }
  0x20   : > { %v323_v2 = vld [vmem:[%s3868_s8 + $0x20] sm:$0xff] (%p3831_p3)  ;;  %v325_v3 = vld [vmem:[%s3868_s8 + $0x30] sm:$0xff] (%p3831_p3)  ;;  %320 = vst [vmem:[%s3876_s29] sm:$0xff] (%p3831_p3), %v319_v0  ;;  %322 = vst [vmem:[%s3876_s29 + $0x8] sm:$0xff] (%p3831_p3), %v321_v1 }
  0x21   : > { %v327_v4 = vld [vmem:[%s3868_s8 + $0x40] sm:$0xff] (%p3831_p3)  ;;  %v329_v5 = vld [vmem:[%s3868_s8 + $0x50] sm:$0xff] (%p3831_p3)  ;;  %324 = vst [vmem:[%s3876_s29 + $0x10] sm:$0xff] (%p3831_p3), %v323_v2  ;;  %326 = vst [vmem:[%s3876_s29 + $0x18] sm:$0xff] (%p3831_p3), %v325_v3 }
  0x22   : > { %328 = vst [vmem:[%s3876_s29 + $0x20] sm:$0xff] (%p3831_p3), %v327_v4  ;;  %330 = vst [vmem:[%s3876_s29 + $0x28] sm:$0xff] (%p3831_p3), %v329_v5  ;;  %v331_v6 = vld [vmem:[%s3868_s8 + $0x60] sm:$0xff] (%p3831_p3)  ;;  %v333_v7 = vld [vmem:[%s3868_s8 + $0x70] sm:$0xff] (%p3831_p3) }
  0x23   : > { %v335_v8 = vld [vmem:[%s3868_s8 + $0x80] sm:$0xff]  ;;  %332 = vst [vmem:[%s3876_s29 + $0x30] sm:$0xff] %v331_v6  ;;  %334 = vst [vmem:[%s3876_s29 + $0x38] sm:$0xff] %v333_v7  ;;  %v337_v9 = vld [vmem:[%s3868_s8 + $0x90] sm:$0xff] }
  0x24   : > { %336 = vst [vmem:[%s3876_s29 + $0x40] sm:$0xff] %v335_v8  ;;  %v339_v10 = vld [vmem:[%s3868_s8 + $0xa0] sm:$0xff]  ;;  %v341_v11 = vld [vmem:[%s3868_s8 + $0xb0] sm:$0xff]  ;;  %338 = vst [vmem:[%s3876_s29 + $0x48] sm:$0xff] %v337_v9 }
  0x25   : > { %340 = vst [vmem:[%s3876_s29 + $0x50] sm:$0xff] %v339_v10  ;;  %342 = vst [vmem:[%s3876_s29 + $0x58] sm:$0xff] %v341_v11  ;;  %v343_v12 = vld [vmem:[%s3868_s8 + $0xc0] sm:$0xff]  ;;  %v345_v13 = vld [vmem:[%s3868_s8 + $0xd0] sm:$0xff] }
  0x26   : > { %v347_v14 = vld [vmem:[%s3868_s8 + $0xe0] sm:$0xff]  ;;  %344 = vst [vmem:[%s3876_s29 + $0x60] sm:$0xff] %v343_v12  ;;  %346 = vst [vmem:[%s3876_s29 + $0x68] sm:$0xff] %v345_v13  ;;  %v349_v15 = vld [vmem:[%s3868_s8 + $0xf0] sm:$0xff] }
  0x27   : > { %348 = vst [vmem:[%s3876_s29 + $0x70] sm:$0xff] %v347_v14  ;;  %v351_v16 = vld [vmem:[%s3868_s8 + $0x100] sm:$0xff]  ;;  %v353_v17 = vld [vmem:[%s3868_s8 + $0x110] sm:$0xff]  ;;  %350 = vst [vmem:[%s3876_s29 + $0x78] sm:$0xff] %v349_v15 }
  0x28   : > { %352 = vst [vmem:[%s3876_s29 + $0x80] sm:$0xff] %v351_v16  ;;  %354 = vst [vmem:[%s3876_s29 + $0x88] sm:$0xff] %v353_v17  ;;  %v355_v18 = vld [vmem:[%s3868_s8 + $0x120] sm:$0xff]  ;;  %v357_v19 = vld [vmem:[%s3868_s8 + $0x130] sm:$0xff] }
  0x29   : > { %v359_v20 = vld [vmem:[%s3868_s8 + $0x140] sm:$0xff]  ;;  %356 = vst [vmem:[%s3876_s29 + $0x90] sm:$0xff] %v355_v18  ;;  %358 = vst [vmem:[%s3876_s29 + $0x98] sm:$0xff] %v357_v19  ;;  %v361_v21 = vld [vmem:[%s3868_s8 + $0x150] sm:$0xff] }
  0x2a   : > { %360 = vst [vmem:[%s3876_s29 + $0xa0] sm:$0xff] %v359_v20  ;;  %v363_v22 = vld [vmem:[%s3868_s8 + $0x160] sm:$0xff]  ;;  %v365_v23 = vld [vmem:[%s3868_s8 + $0x170] sm:$0xff]  ;;  %362 = vst [vmem:[%s3876_s29 + $0xa8] sm:$0xff] %v361_v21 }
  0x2b   : > { %364 = vst [vmem:[%s3876_s29 + $0xb0] sm:$0xff] %v363_v22  ;;  %366 = vst [vmem:[%s3876_s29 + $0xb8] sm:$0xff] %v365_v23  ;;  %v367_v24 = vld [vmem:[%s3868_s8 + $0x180] sm:$0xff]  ;;  %v369_v25 = vld [vmem:[%s3868_s8 + $0x190] sm:$0xff] }
  0x2c   : > { %v371_v26 = vld [vmem:[%s3868_s8 + $0x1a0] sm:$0xff]  ;;  %368 = vst [vmem:[%s3876_s29 + $0xc0] sm:$0xff] %v367_v24  ;;  %370 = vst [vmem:[%s3876_s29 + $0xc8] sm:$0xff] %v369_v25  ;;  %v373_v27 = vld [vmem:[%s3868_s8 + $0x1b0] sm:$0xff] }
  0x2d   : > { %372 = vst [vmem:[%s3876_s29 + $0xd0] sm:$0xff] %v371_v26  ;;  %v375_v28 = vld [vmem:[%s3868_s8 + $0x1c0] sm:$0xff]  ;;  %v377_v29 = vld [vmem:[%s3868_s8 + $0x1d0] sm:$0xff]  ;;  %374 = vst [vmem:[%s3876_s29 + $0xd8] sm:$0xff] %v373_v27 }
  0x2e   : > { %376 = vst [vmem:[%s3876_s29 + $0xe0] sm:$0xff] %v375_v28  ;;  %378 = vst [vmem:[%s3876_s29 + $0xe8] sm:$0xff] %v377_v29  ;;  %v379_v30 = vld [vmem:[%s3868_s8 + $0x1e0] sm:$0xff]  ;;  %v381_v31 = vld [vmem:[%s3868_s8 + $0x1f0] sm:$0xff] }
  0x2f   : > { %v383_v32 = vld [vmem:[%s3868_s8 + $0x200] sm:$0xff]  ;;  %380 = vst [vmem:[%s3876_s29 + $0xf0] sm:$0xff] %v379_v30  ;;  %382 = vst [vmem:[%s3876_s29 + $0xf8] sm:$0xff] %v381_v31  ;;  %v385_v33 = vld [vmem:[%s3868_s8 + $0x210] sm:$0xff] }
  0x30   : > { %384 = vst [vmem:[%s3876_s29 + $0x100] sm:$0xff] %v383_v32  ;;  %v387_v34 = vld [vmem:[%s3868_s8 + $0x220] sm:$0xff]  ;;  %v389_v35 = vld [vmem:[%s3868_s8 + $0x230] sm:$0xff]  ;;  %386 = vst [vmem:[%s3876_s29 + $0x108] sm:$0xff] %v385_v33 }
  0x31   : > { %388 = vst [vmem:[%s3876_s29 + $0x110] sm:$0xff] %v387_v34  ;;  %390 = vst [vmem:[%s3876_s29 + $0x118] sm:$0xff] %v389_v35  ;;  %v391_v36 = vld [vmem:[%s3868_s8 + $0x240] sm:$0xff]  ;;  %v393_v37 = vld [vmem:[%s3868_s8 + $0x250] sm:$0xff] }
  0x32   : > { %v395_v38 = vld [vmem:[%s3868_s8 + $0x260] sm:$0xff]  ;;  %392 = vst [vmem:[%s3876_s29 + $0x120] sm:$0xff] %v391_v36  ;;  %394 = vst [vmem:[%s3876_s29 + $0x128] sm:$0xff] %v393_v37  ;;  %v397_v39 = vld [vmem:[%s3868_s8 + $0x270] sm:$0xff] }
  0x33   : > { %396 = vst [vmem:[%s3876_s29 + $0x130] sm:$0xff] %v395_v38  ;;  %v399_v40 = vld [vmem:[%s3868_s8 + $0x280] sm:$0xff]  ;;  %v401_v41 = vld [vmem:[%s3868_s8 + $0x290] sm:$0xff]  ;;  %398 = vst [vmem:[%s3876_s29 + $0x138] sm:$0xff] %v397_v39 }
  0x34   : > { %400 = vst [vmem:[%s3876_s29 + $0x140] sm:$0xff] %v399_v40  ;;  %402 = vst [vmem:[%s3876_s29 + $0x148] sm:$0xff] %v401_v41  ;;  %v403_v42 = vld [vmem:[%s3868_s8 + $0x2a0] sm:$0xff]  ;;  %v405_v43 = vld [vmem:[%s3868_s8 + $0x2b0] sm:$0xff] }
  0x35   : > { %v407_v44 = vld [vmem:[%s3868_s8 + $0x2c0] sm:$0xff]  ;;  %404 = vst [vmem:[%s3876_s29 + $0x150] sm:$0xff] %v403_v42  ;;  %406 = vst [vmem:[%s3876_s29 + $0x158] sm:$0xff] %v405_v43  ;;  %v409_v45 = vld [vmem:[%s3868_s8 + $0x2d0] sm:$0xff] }
  0x36   : > { %408 = vst [vmem:[%s3876_s29 + $0x160] sm:$0xff] %v407_v44  ;;  %v411_v46 = vld [vmem:[%s3868_s8 + $0x2e0] sm:$0xff]  ;;  %v413_v47 = vld [vmem:[%s3868_s8 + $0x2f0] sm:$0xff]  ;;  %410 = vst [vmem:[%s3876_s29 + $0x168] sm:$0xff] %v409_v45 }
  0x37   : > { %412 = vst [vmem:[%s3876_s29 + $0x170] sm:$0xff] %v411_v46  ;;  %414 = vst [vmem:[%s3876_s29 + $0x178] sm:$0xff] %v413_v47 }
  0x38 PF: > { %p2864_p0 = scmp.ge.s32.totalorder %s3735_s24, 1  ;;  %p432_p1 = scmp.lt.s32.totalorder %s3735_s24, 5 }
  0x3a   : > { %p433_p2 = pnand %p2864_p0, %p432_p1 }
  0x3b   : > { %v522_v48 = vld [vmem:[%s4373_s3] sm:$0x3f] (!%p433_p2)  ;;  %v528_v49 = vlaneseq (!%p433_p2)  ;;  %vm565_vm0 = vcmask (!%p433_p2), 1040384   ;;  %v3737_v50 = vmov (!%p433_p2), 1983009808   ;;  %s2868_s9 = sshll.u32 (!%p433_p2), %s3723_s21, 1 }
  0x3c   : > { %436 = sbr.rel (%p433_p2) target bundleno = 843 (0x34b), region = 70  ;;  %v526_v51 = vunpack.c.l.s4 (!%p433_p2), %v3737_v50  ;;  %s486_s13 = sadd.s32 (!%p433_p2), %s3719_s20, %s2868_s9  ;;  %v524_v53 = vcombine.high (!%p433_p2), %v522_v48, %v522_v48  ;;  %vm566_vm1 = vcmask (!%p433_p2), 1041408   ;;  %v3738_v55 = vmov (!%p433_p2), 65535   ;;  %v1630_v50 = vld [vmem:[%s4373_s3] sm:$0x3f] (!%p433_p2) }
  0x3d   : > { %v529_v52 = vshrl.u32 (!%p433_p2), %v528_v49, 7  ;;  %v567_v56 = vsel (!%p433_p2), %vm565_vm0, 4294967295, %v3738_v55  ;;  %s2869_s14 = sshll.u32 (!%p433_p2), %s486_s13, 4  ;;  %v3739_v57 = vmov (!%p433_p2), 0   ;;  %s439_s25 = sand.u32 (!%p433_p2), 1, %s3711_s18   ;;  %vm540_vm2 = vcmask (!%p433_p2), 23552  }
  0x3e   : > { %v527_v54 = vunpack.c.0.s8 (!%p433_p2), %v526_v51  ;;  %610 = vmatprep.mubr.bf16.mxu0 (!%p433_p2), %v3739_v57  ;;  %p488_p3 = scmp.lt.s32.totalorder (!%p433_p2), %s2869_s14, 63  ;;  %v3981_v59 = vsel (!%p433_p2), %vm566_vm1, %v567_v56, 0  ;;  %s3479_s18 = smul.u32 (!%p433_p2), 384, %s439_s25 }
  0x3f   : > { %s3740_s30 = smov (!%p433_p2), 125   ;;  %s2866_s25 = sshll.u32 (!%p433_p2), %s3719_s20, 4 }
  0x40   : > { %v3978_v58 = vsub.s32 (!%p433_p2), %v527_v54, %v529_v52  ;;  %s4007_s6 = scalar_lea.vmem (!%p433_p2), [#allocation2], %s3479_s18  ;;  %v1656_v52 = vcombine.high (!%p433_p2), %v1630_v50, %v1630_v50  ;;  %p478_p4 = scmp.lt.s32.totalorder (!%p433_p2), %s2866_s25, 31 }
  0x41   : > { %v3576_v16 = vld [vmem:[%s4007_s6 + $0x100] ss:$8 sps:$4 sm:$0xff] (!%p433_p2)   ;;  %v3577_v18 = vld [vmem:[%s4007_s6 + $0x110] ss:$8 sps:$4 sm:$0xff] (!%p433_p2)   ;;  %s474_s18 = sand.u32 (!%p433_p2), 1, %s3703_s16   ;;  %s3199_s13 = sshll.u32 (!%p433_p2), %s3719_s20, 6 }
  0x42   : > { %v538_v60 = vrot.slane (!%p433_p2), %v524_v53, %v3978_v58  ;;  %v531_v61 = vrot.slane (!%p433_p2), %v522_v48, %v3978_v58  ;;  %v3578_v25 = vld [vmem:[%s4007_s6 + $0x120] ss:$8 sps:$4 sm:$0xff] (!%p433_p2)   ;;  %v3579_v27 = vld [vmem:[%s4007_s6 + $0x130] ss:$8 sps:$4 sm:$0xff] (!%p433_p2)   ;;  %v1663_v51 = vrot.slane (!%p433_p2), %v1630_v50, %v3978_v58  ;;  %v1670_v54 = vrot.slane (!%p433_p2), %v1656_v52, %v3978_v58  ;;  %s4312_s5 = scalar_lea.sflag (!%p433_p2), [#allocation4], %s474_s18 }
  0x43   : > { %s4394_s14 = smov (!%p488_p3, %s2869_s14), 63  ;;  %v3581_v28 = vld [vmem:[%s4007_s6 + $0x80] ss:$8 sps:$4 sm:$0xff]   ;;  %v3583_v32 = vld [vmem:[%s4007_s6 + $0x90] ss:$8 sps:$4 sm:$0xff]   ;;  %s4396_s25 = smov (!%p478_p4, %s2866_s25), 31 }
  0x44   : > { %s2870_s26 = sshll.u32 %s4394_s14, 3  ;;  %v576_v62 = vand.u32 %v3981_v59, %v538_v60  ;;  %v539_v63 = vcombine.high %v531_v61, %v531_v61  ;;  %v570_v0 = vand.u32 %v3981_v59, %v531_v61  ;;  %v3582_v30 = vld [vmem:[%s4007_s6] ss:$8 sps:$4 sm:$0xff]   ;;  %v3584_v34 = vld [vmem:[%s4007_s6 + $0x10] ss:$8 sps:$4 sm:$0xff]   ;;  %v1671_v53 = vcombine.high %v1663_v51, %v1663_v51  ;;  %s2747_s14 = sadd.s32 %s3199_s13, %s2868_s9 }
  0x45   : > { %s3989_s29 = scalar_lea.vmem %s4372_s2, %s2870_s26  ;;  %v3580_v33 = vld [vmem:[%s4007_s6 + $0x140] ss:$8 sps:$4 sm:$0xff]   ;;  %v3585_v35 = vld [vmem:[%s4007_s6 + $0x150] ss:$8 sps:$4 sm:$0xff]   ;;  %v4073_v56 = vand.u32 %v1670_v54, %v3981_v59  ;;  %s3480_s26 = smul.u32 12, %s4396_s25 }
  0x46   : > { %v498_v1 = vld [vmem:[%s3989_s29] sm:$0xff]  ;;  %v499_v2 = vld [vmem:[%s3989_s29 + $0x8] sm:$0xff]  ;;  %v500_v3 = vld [vmem:[%s3989_s29 + $0x10] sm:$0xff]  ;;  %3378 = vmatprep.subr.bf16.mxu1 %v576_v62  ;;  %v573_v4 = vand.u32 %v3981_v59, %v539_v63  ;;  %v1700_v55 = vand.u32 %v1671_v53, %v3981_v59  ;;  %s3099_s20 = sshll.u32 %s2747_s14, 6 }
  0x47   : > { %v514_v5 = vpack.c.bf16 %v499_v2, %v498_v1  ;;  %v501_v6 = vld [vmem:[%s3989_s29 + $0x18] sm:$0xff]  ;;  %v502_v7 = vld [vmem:[%s3989_s29 + $0x20] sm:$0xff]  ;;  %v503_v8 = vld [vmem:[%s3989_s29 + $0x28] sm:$0xff]  ;;  %3379 = vmatpush3.bf16.msra.mxu1 %v576_v62 }
  0x48   : > { %v515_v9 = vpack.c.bf16 %v501_v6, %v500_v3  ;;  %v516_v10 = vpack.c.bf16 %v503_v8, %v502_v7  ;;  %578 = vmatprep.subr.bf16.mxu0 %v573_v4  ;;  %v504_v11 = vld [vmem:[%s3989_s29 + $0x30] sm:$0xff]  ;;  %v505_v12 = vld [vmem:[%s3989_s29 + $0x38] sm:$0xff]  ;;  %v506_v13 = vld [vmem:[%s3989_s29 + $0x40] sm:$0xff]  ;;  %3209 = vmatprep.subr.bf16.mxu1 %v3581_v28 }
  0x49   : > { %3380 = vmatprep.mubr.msk.bf16.mxu1 %vm540_vm2, %v514_v5  ;;  %579 = vmatpush1.bf16.msra.mxu0 %v570_v0  ;;  %v507_v14 = vld [vmem:[%s3989_s29 + $0x48] sm:$0xff]  ;;  %v508_v15 = vld [vmem:[%s3989_s29 + $0x50] sm:$0xff]  ;;  %v517_v17 = vpack.c.bf16 %v505_v12, %v504_v11  ;;  %v509_v19 = vld [vmem:[%s3989_s29 + $0x58] sm:$0xff] }
  0x4a   : > { %1639 = vrot.lane.b32.xlu0 %v514_v5, %s3740_s30  ;;  %3381 = vmatmul.mubr.msk.bf16.vlgmr.msra.gmra.mrb[0].mxu1 %vm540_vm2, %v515_v9  ;;  %v510_v20 = vld [vmem:[%s3989_s29 + $0x60] sm:$0xff]  ;;  %v511_v21 = vld [vmem:[%s3989_s29 + $0x68] sm:$0xff]  ;;  %v518_v22 = vpack.c.bf16 %v507_v14, %v506_v13  ;;  %v512_v23 = vld [vmem:[%s3989_s29 + $0x70] sm:$0xff]  ;;  %v519_v24 = vpack.c.bf16 %v509_v19, %v508_v15 }
  0x4b   : > { %1643 = vrot.lane.b32.xlu1 %v516_v10, %s3740_s30  ;;  %3384 = vmatprep.mubr.msk.bf16.mxu1 %vm540_vm2, %v516_v10  ;;  %v513_v26 = vld [vmem:[%s3989_s29 + $0x78] sm:$0xff]  ;;  %v520_v29 = vpack.c.bf16 %v511_v21, %v510_v20  ;;  %v3586_v36 = vld [vmem:[%s4007_s6 + $0xa0] ss:$8 sps:$4 sm:$0xff]   ;;  %s4080_s29 = scalar_lea.vmem %s4370_s0, %s3480_s26  ;;  %s4302_s26 = scalar_lea.hbm %s4374_s4, %s3099_s20 }
  0x4c   : > { %2871 = vmatmul.mubr.msk.bf16.vlgmr.msra.gmra.mrb[0].mxu0 %vm540_vm2, %v514_v5  ;;  %3396 = vmatprep.subr.bf16.mxu0 %v3576_v16  ;;  %v521_v31 = vpack.c.bf16 %v513_v26, %v512_v23  ;;  %v3587_v37 = vld [vmem:[%s4007_s6 + $0x20] ss:$8 sps:$4 sm:$0xff]   ;;  %v3588_v38 = vld [vmem:[%s4007_s6 + $0xb0] ss:$8 sps:$4 sm:$0xff]   ;;  %v819_v2 = vld [vmem:[%s4080_s29 + $0x2c] sm:$0xf] }
  0x4d   : > { %620 = vmatprep.mubr.bf16.mxu0 %v3739_v57  ;;  %3397 = vmatpush3.bf16.msra.mxu0 %v3576_v16  ;;  %v3590_v39 = vld [vmem:[%s4007_s6 + $0x160] ss:$8 sps:$4 sm:$0xff]   ;;  %v3589_v40 = vld [vmem:[%s4007_s6 + $0x30] ss:$8 sps:$4 sm:$0xff]   ;;  %v815_v7 = vld [vmem:[%s4080_s29 + $0x14] sm:$0xf] }
  0x4e   : > { %1641 = vrot.lane.b32.xlu0 %v515_v9, %s3740_s30  ;;  %3398 = vmatprep.subr.bf16.mxu0 %v3577_v18  ;;  %v3591_v41 = vld [vmem:[%s4007_s6 + $0xc0] ss:$8 sps:$4 sm:$0xff]   ;;  %v3593_v43 = vld [vmem:[%s4007_s6 + $0xd0] ss:$8 sps:$4 sm:$0xff]  }
  0x4f   : > { %1645 = vrot.lane.b32.xlu1 %v517_v17, %s3740_s30  ;;  %3210 = vmatpush3.bf16.msra.mxu1 %v3582_v30  ;;  %v3592_v42 = vld [vmem:[%s4007_s6 + $0x40] ss:$8 sps:$4 sm:$0xff]   ;;  %v3594_v44 = vld [vmem:[%s4007_s6 + $0x50] ss:$8 sps:$4 sm:$0xff]  }
  0x50   : > { %3211 = vmatprep.subr.bf16.mxu1 %v3583_v32  ;;  %v3596_v45 = vld [vmem:[%s4007_s6 + $0xe0] ss:$8 sps:$4 sm:$0xff]   ;;  %v3595_v47 = vld [vmem:[%s4007_s6 + $0x170] ss:$8 sps:$4 sm:$0xff]   ;;  %v827_v32 = vld [vmem:[%s4080_s29 + $0x5c] sm:$0xf] }
  0x51   : > { %3399 = vmatpush3.bf16.msra.mxu0 %v3577_v18  ;;  %v3597_v46 = vld [vmem:[%s4007_s6 + $0x60] ss:$8 sps:$4 sm:$0xff]   ;;  %v3598_v48 = vld [vmem:[%s4007_s6 + $0xf0] ss:$8 sps:$4 sm:$0xff]  }
  0x52   : > { %1647 = vrot.lane.b32.xlu0 %v518_v22, %s3740_s30  ;;  %3385 = vmatmul.mubr.msk.bf16.gmra.mrb[4].mxu1 %vm540_vm2, %v517_v17  ;;  %v3599_v49 = vld [vmem:[%s4007_s6 + $0x70] ss:$8 sps:$4 sm:$0xff]   ;;  %v817_v62 = vld [vmem:[%s4080_s29 + $0x20] sm:$0xf]  ;;  %v813_v3 = vld [vmem:[%s4080_s29 + $0x8] sm:$0xf] }
  0x53   : > { %1649 = vrot.lane.b32.xlu1 %v519_v24, %s3740_s30  ;;  %3388 = vmatprep.mubr.msk.bf16.mxu1 %vm540_vm2, %v518_v22  ;;  %v4087_v13 = vld [vmem:[%s4080_s29] sm:$0xff]  ;;  %v4090_v15 = vld [vmem:[%s4080_s29 + $0xc] sm:$0xff] }
  0x54   : > { %2872 = vmatmul.mubr.msk.bf16.gmra.mrb[4].mxu0 %vm540_vm2, %v515_v9  ;;  %3400 = vmatprep.subr.bf16.mxu0 %v3578_v25  ;;  %v825_v28 = vld [vmem:[%s4080_s29 + $0x50] sm:$0xf] }
  0x55   : > { %630 = vmatprep.mubr.bf16.mxu0 %v3739_v57  ;;  %3401 = vmatpush3.bf16.msra.mxu0 %v3578_v25 }
  0x56   : > { %1651 = vrot.lane.b32.xlu0 %v520_v29, %s3740_s30  ;;  %3402 = vmatprep.subr.bf16.mxu0 %v3579_v27 }
  0x57   : > { %1653 = vrot.lane.b32.xlu1 %v521_v31, %s3740_s30  ;;  %3212 = vmatpush3.bf16.msra.mxu1 %v3584_v34  ;;  %v821_v34 = vld [vmem:[%s4080_s29 + $0x38] sm:$0xf]  ;;  %s2865_s30 = sshll.u32 %s474_s18, 7 }
  0x58   : > { %3213 = vmatprep.subr.bf16.mxu1 %v3586_v36 }
  0x59   : > { %3403 = vmatpush3.bf16.msra.mxu0 %v3579_v27 }
  0x5a   : > { %3389 = vmatmul.mubr.msk.bf16.gmra.mrb[8].mxu1 %vm540_vm2, %v519_v24  ;;  %3404 = vmatprep.subr.bf16.mxu0 %v3580_v33 }
  0x5b   : > { %3392 = vmatprep.mubr.msk.bf16.mxu1 %vm540_vm2, %v520_v29  ;;  %3214 = vmatpush3.bf16.msra.mxu1 %v3587_v37 }
  0x5c   : > { %2873 = vmatmul.mubr.msk.bf16.gmra.mrb[8].mxu0 %vm540_vm2, %v516_v10  ;;  %3215 = vmatprep.subr.bf16.mxu1 %v3588_v38  ;;  %v823_v38 = vld [vmem:[%s4080_s29 + $0x44] sm:$0xf] }
  0x5d   : > { %640 = vmatprep.mubr.bf16.mxu0 %v3739_v57  ;;  %3405 = vmatpush3.bf16.msra.mxu0 %v3580_v33 }
  0x5e   : > { %3406 = vmatprep.subr.bf16.mxu0 %v3585_v35 }
  0x5f   : > { %3216 = vmatpush3.bf16.msra.mxu1 %v3589_v40 }
  0x60   : > { %3217 = vmatprep.subr.bf16.mxu1 %v3591_v41 }
  0x61   : > { %3407 = vmatpush3.bf16.msra.mxu0 %v3585_v35 }
  0x62   : > { %3393 = vmatmul.mubr.msk.bf16.gmra.mrb[12].mxu1 %vm540_vm2, %v521_v31  ;;  %3408 = vmatprep.subr.bf16.mxu0 %v3590_v39 }
  0x63   : > { %3218 = vmatpush3.bf16.msra.mxu1 %v3592_v42 }
  0x64   : > { %2874 = vmatmul.mubr.msk.bf16.gmra.mrb[12].mxu0 %vm540_vm2, %v517_v17  ;;  %3219 = vmatprep.subr.bf16.mxu1 %v3593_v43  ;;  %v4100_v43 = vld [vmem:[%s4080_s29 + $0x18] sm:$0xff] }
  0x65   : > { %650 = vmatprep.mubr.bf16.mxu0 %v3739_v57  ;;  %3409 = vmatpush3.bf16.msra.mxu0 %v3590_v39 }
  0x66   : > { %3410 = vmatprep.subr.bf16.mxu0 %v3595_v47 }
  0x67   : > { %3220 = vmatpush3.bf16.msra.mxu1 %v3594_v44 }
  0x68   : > { %3221 = vmatprep.subr.bf16.mxu1 %v3596_v45  ;;  %v4103_v45 = vld [vmem:[%s4080_s29 + $0x24] sm:$0xff] }
  0x69   : > { %3411 = vmatpush3.bf16.msra.mxu0 %v3595_v47 }
  0x6a   : > { %1705 = vmatprep.subr.bf16.mxu0 %v1700_v55 }
  0x6b   : > { %3222 = vmatpush3.bf16.msra.mxu1 %v3597_v46 }
  0x6c   : > { %2875 = vmatmul.mubr.msk.bf16.gmra.mrb[16].mxu0 %vm540_vm2, %v518_v22  ;;  %3223 = vmatprep.subr.bf16.mxu1 %v3598_v48 }
  0x6d   : > { %660 = vmatprep.mubr.bf16.mxu0 %v3739_v57 }
  0x6f   : > { %3224 = vmatpush3.bf16.msra.mxu1 %v3599_v49 }
  0x70   : > { %3428 = vmatprep.subr.bf16.mxu1 %v4073_v56 }
  0x74   : > { %2876 = vmatmul.mubr.msk.bf16.gmra.mrb[20].mxu0 %vm540_vm2, %v519_v24  ;;  %v1697_v24 = vand.u32 %v1663_v51, %v3981_v59 }
  0x75   : > { %670 = vmatprep.mubr.bf16.mxu0 %v3739_v57 }
  0x7c   : > { %2877 = vmatmul.mubr.msk.bf16.gmra.mrb[24].mxu0 %vm540_vm2, %v520_v29 }
  0x7d   : > { %680 = vmatprep.mubr.bf16.mxu0 %v3739_v57 }
  0x84   : > { %2878 = vmatmul.mubr.msk.bf16.gmra.mrb[28].mxu0 %vm540_vm2, %v521_v31 }
 0x11d   : > { %v3382_v58 = vpop.f32.mrb[0].mxu1 }
 0x11e   : > { %v3108_v60 = vpack.c.bf16 %v3382_v58, %v3382_v58  ;;  %v725_v61 = vpop.f32.mrb[1].mxu1  ;;  %v833_v58 = vld [vmem:[%s4080_s29 + $0x80] sm:$0xf] }
 0x11f   : > { %v3104_v63 = vpack.c.bf16 %v725_v61, %v725_v61  ;;  %v612_v0 = vpop.f32.mrb[0].mxu0  ;;  %v3383_v1 = vpop.f32.mrb[2].mxu1 }
 0x120   : > { %v3110_v4 = vpack.c.bf16 %v3383_v1, %v3383_v1  ;;  %v614_v5 = vpop.f32.mrb[1].mxu0  ;;  %v728_v6 = vpop.f32.mrb[3].mxu1  ;;  %v985_v11 = vmul.bf16 %v3108_v60, %v817_v62  ;;  %v829_v1 = vld [vmem:[%s4080_s29 + $0x68] sm:$0xf] }
 0x121   : > { %v3103_v8 = vpack.c.bf16 %v614_v5, %v612_v0  ;;  %v3106_v9 = vpack.c.bf16 %v728_v6, %v728_v6  ;;  %v616_v10 = vpop.f32.mrb[2].mxu0  ;;  %v981_v16 = vmul.bf16 %v3104_v63, %v813_v3  ;;  %v835_v63 = vld [vmem:[%s4080_s29 + $0x8c] sm:$0xf]  ;;  %v831_v5 = vld [vmem:[%s4080_s29 + $0x74] sm:$0xf] }
 0x122   : > { %v987_v12 = vmul.bf16 %v3110_v4, %v819_v2  ;;  %v618_v14 = vpop.f32.mrb[3].mxu0 }
 0x123   : > { %v983_v17 = vmul.bf16 %v3106_v9, %v815_v7  ;;  %v3105_v18 = vpack.c.bf16 %v618_v14, %v616_v10  ;;  %v980_v20 = vmul.bf16 %v3103_v8, %v4087_v13  ;;  %v4116_v14 = vld [vmem:[%s4080_s29 + $0x3c] sm:$0xff] }
 0x124   : > { %v2924_v19 = vcombine.low %v985_v11, %v987_v12  ;;  %v4113_v11 = vld [vmem:[%s4080_s29 + $0x30] sm:$0xff] }
 0x125   : > { %v982_v21 = vmul.bf16 %v3105_v18, %v4090_v15  ;;  %v3386_v22 = vpop.f32.mrb[4].mxu1  ;;  %v2921_v23 = vcombine.low %v981_v16, %v983_v17 }
 0x126   : > { %v3116_v25 = vpack.c.bf16 %v3386_v22, %v3386_v22  ;;  %v741_v26 = vpop.f32.mrb[5].mxu1 }
 0x127   : > { %v2919_v27 = vcombine.low %v980_v20, %v982_v21  ;;  %v3112_v29 = vpack.c.bf16 %v741_v26, %v741_v26  ;;  %v622_v30 = vpop.f32.mrb[4].mxu0  ;;  %v3387_v31 = vpop.f32.mrb[6].mxu1  ;;  %3412 = vmatprep.mubr.bf16.mxu0 %v2921_v23  ;;  %v2920_v33 = vcombine.high %v980_v20, %v982_v21  ;;  %v841_v26 = vld [vmem:[%s4080_s29 + $0xb0] sm:$0xf] }
 0x128   : > { %v3118_v35 = vpack.c.bf16 %v3387_v31, %v3387_v31  ;;  %v624_v36 = vpop.f32.mrb[5].mxu0  ;;  %v744_v37 = vpop.f32.mrb[7].mxu1  ;;  %3413 = vmatmul.mubr.bf16.vlgmr.msra.gmra.mrb[32].mxu0 %v2924_v19  ;;  %v993_v41 = vmul.bf16 %v3116_v25, %v825_v28 }
 0x129   : > { %v3107_v39 = vpack.c.bf16 %v624_v36, %v622_v30  ;;  %v3114_v59 = vpack.c.bf16 %v744_v37, %v744_v37  ;;  %1706 = vmatpush1.bf16.msra.mxu0 %v1697_v24  ;;  %v626_v40 = vpop.f32.mrb[6].mxu0  ;;  %1364 = vmatprep.mubr.bf16.mxu1 %v2920_v33  ;;  %v989_v46 = vmul.bf16 %v3112_v29, %v821_v34  ;;  %v843_v30 = vld [vmem:[%s4080_s29 + $0xbc] sm:$0xf]  ;;  %v837_v33 = vld [vmem:[%s4080_s29 + $0x98] sm:$0xf] }
 0x12a   : > { %v995_v42 = vmul.bf16 %v3118_v35, %v827_v32  ;;  %v628_v44 = vpop.f32.mrb[7].mxu0  ;;  %1365 = vmatmul.mubr.bf16.vlgmr.msra.gmra.mrb[16].mxu1 %v2919_v27  ;;  %v839_v37 = vld [vmem:[%s4080_s29 + $0xa4] sm:$0xf] }
 0x12b   : > { %v991_v47 = vmul.bf16 %v3114_v59, %v823_v38  ;;  %v3109_v48 = vpack.c.bf16 %v628_v44, %v626_v40  ;;  %3429 = vmatpush3.bf16.msra.mxu1 %v4073_v56  ;;  %v984_v50 = vmul.bf16 %v3107_v39, %v4100_v43 }
 0x12c   : > { %v2930_v49 = vcombine.low %v993_v41, %v995_v42  ;;  %v4125_v42 = vld [vmem:[%s4080_s29 + $0x48] sm:$0xff] }
 0x12d   : > { %v986_v51 = vmul.bf16 %v3109_v48, %v4103_v45  ;;  %v3390_v52 = vpop.f32.mrb[8].mxu1  ;;  %v2927_v53 = vcombine.low %v989_v46, %v991_v47  ;;  %v4128_v46 = vld [vmem:[%s4080_s29 + $0x54] sm:$0xff] }
 0x12e   : > { %v3124_v54 = vpack.c.bf16 %v3390_v52, %v3390_v52  ;;  %v757_v55 = vpop.f32.mrb[9].mxu1 }
 0x12f   : > { %v3120_v60 = vpack.c.bf16 %v757_v55, %v757_v55  ;;  %v632_v61 = vpop.f32.mrb[8].mxu0  ;;  %v3391_v62 = vpop.f32.mrb[10].mxu1  ;;  %3416 = vmatprep.mubr.bf16.mxu0 %v2927_v53  ;;  %v2923_v0 = vcombine.high %v984_v50, %v986_v51  ;;  %v2922_v56 = vcombine.low %v984_v50, %v986_v51 }
 0x130   : > { %v3126_v2 = vpack.c.bf16 %v3391_v62, %v3391_v62  ;;  %v634_v3 = vpop.f32.mrb[9].mxu0  ;;  %v760_v4 = vpop.f32.mrb[11].mxu1  ;;  %3417 = vmatmul.mubr.bf16.gmra.mrb[36].mxu0 %v2930_v49  ;;  %v1001_v9 = vmul.bf16 %v3124_v54, %v833_v58 }
 0x131   : > { %v3111_v6 = vpack.c.bf16 %v634_v3, %v632_v61  ;;  %v3122_v7 = vpack.c.bf16 %v760_v4, %v760_v4  ;;  %v636_v8 = vpop.f32.mrb[10].mxu0  ;;  %1372 = vmatprep.mubr.bf16.mxu1 %v2923_v0  ;;  %v997_v16 = vmul.bf16 %v3120_v60, %v829_v1  ;;  %v1640_v4 = vpop.permute.xlu0 %1639 }
 0x132   : > { %v1003_v10 = vmul.bf16 %v3126_v2, %v835_v63  ;;  %v638_v12 = vpop.f32.mrb[11].mxu0  ;;  %1373 = vmatmul.mubr.bf16.gmra.mrb[20].mxu1 %v2922_v56  ;;  %v4134_v63 = vld [vmem:[%s4080_s29 + $0x60] sm:$0xff]  ;;  %v4137_v56 = vld [vmem:[%s4080_s29 + $0x6c] sm:$0xff] }
 0x133   : > { %v999_v17 = vmul.bf16 %v3122_v7, %v831_v5  ;;  %v3113_v18 = vpack.c.bf16 %v638_v12, %v636_v8  ;;  %v988_v20 = vmul.bf16 %v3111_v6, %v4113_v11  ;;  %v4144_v12 = vld [vmem:[%s4080_s29 + $0x78] sm:$0xff] }
 0x134   : > { %v2936_v19 = vcombine.low %v1001_v9, %v1003_v10 }
 0x135   : > { %v990_v21 = vmul.bf16 %v3113_v18, %v4116_v14  ;;  %v3394_v22 = vpop.f32.mrb[12].mxu1  ;;  %v2933_v23 = vcombine.low %v997_v16, %v999_v17  ;;  %v4147_v17 = vld [vmem:[%s4080_s29 + $0x84] sm:$0xff] }
 0x136   : > { %v3132_v24 = vpack.c.bf16 %v3394_v22, %v3394_v22  ;;  %v773_v25 = vpop.f32.mrb[13].mxu1 }
 0x137   : > { %v3128_v27 = vpack.c.bf16 %v773_v25, %v773_v25  ;;  %v642_v28 = vpop.f32.mrb[12].mxu0  ;;  %v3395_v29 = vpop.f32.mrb[14].mxu1  ;;  %3420 = vmatprep.mubr.bf16.mxu0 %v2933_v23  ;;  %v2926_v31 = vcombine.high %v988_v20, %v990_v21  ;;  %v2925_v32 = vcombine.low %v988_v20, %v990_v21 }
 0x138   : > { %v3134_v34 = vpack.c.bf16 %v3395_v29, %v3395_v29  ;;  %v644_v35 = vpop.f32.mrb[13].mxu0  ;;  %v776_v36 = vpop.f32.mrb[15].mxu1  ;;  %3421 = vmatmul.mubr.bf16.gmra.mrb[40].mxu0 %v2936_v19  ;;  %v1009_v40 = vmul.bf16 %v3132_v24, %v841_v26 }
 0x139   : > { %v3115_v38 = vpack.c.bf16 %v644_v35, %v642_v28  ;;  %v3130_v39 = vpack.c.bf16 %v776_v36, %v776_v36  ;;  %v646_v59 = vpop.f32.mrb[14].mxu0  ;;  %1380 = vmatprep.mubr.bf16.mxu1 %v2926_v31  ;;  %v1005_v47 = vmul.bf16 %v3128_v27, %v837_v33  ;;  %v1642_v21 = vpop.permute.xlu0 %1641  ;;  %v4154_v28 = vld [vmem:[%s4080_s29 + $0x90] sm:$0xff] }
 0x13a   : > { %v1011_v41 = vmul.bf16 %v3134_v34, %v843_v30  ;;  %v648_v44 = vpop.f32.mrb[15].mxu0  ;;  %1381 = vmatmul.mubr.bf16.gmra.mrb[24].mxu1 %v2925_v32  ;;  %v4157_v30 = vld [vmem:[%s4080_s29 + $0x9c] sm:$0xff]  ;;  %v1644_v34 = vpop.permute.xlu1 %1643 }
 0x13b   : > { %v1007_v48 = vmul.bf16 %v3130_v39, %v839_v37  ;;  %v3117_v49 = vpack.c.bf16 %v648_v44, %v646_v59  ;;  %v992_v51 = vmul.bf16 %v3115_v38, %v4125_v42  ;;  %v4167_v44 = vld [vmem:[%s4080_s29 + $0xb4] sm:$0xff] }
 0x13c   : > { %v2942_v50 = vcombine.low %v1009_v40, %v1011_v41  ;;  %v4164_v40 = vld [vmem:[%s4080_s29 + $0xa8] sm:$0xff] }
 0x13d   : > { %v994_v52 = vmul.bf16 %v3117_v49, %v4128_v46  ;;  %v2939_v53 = vcombine.low %v1005_v47, %v1007_v48 }
 0x13f   : > { %v652_v54 = vpop.f32.mrb[16].mxu0  ;;  %3424 = vmatprep.mubr.bf16.mxu0 %v2939_v53  ;;  %v2929_v55 = vcombine.high %v992_v51, %v994_v52  ;;  %v2928_v58 = vcombine.low %v992_v51, %v994_v52  ;;  %v1648_v53 = vpop.permute.xlu0 %1647 }
 0x140   : > { %v654_v60 = vpop.f32.mrb[17].mxu0  ;;  %3425 = vmatmul.mubr.bf16.gmra.mrb[44].mxu0 %v2942_v50  ;;  %v1646_v50 = vpop.permute.xlu1 %1645 }
 0x141   : > { %v3119_v61 = vpack.c.bf16 %v654_v60, %v652_v54  ;;  %v656_v62 = vpop.f32.mrb[18].mxu0  ;;  %1388 = vmatprep.mubr.bf16.mxu1 %v2929_v55  ;;  %1737 = vmatprep.mubr.bf16.mxu0 %v3739_v57  ;;  %v3601_v60 = vld [vmem:[%s4007_s6 + $0x84] ss:$8 sps:$4 sm:$0xff]  }
 0x142   : > { %v658_v0 = vpop.f32.mrb[19].mxu0  ;;  %1389 = vmatmul.mubr.bf16.gmra.mrb[28].mxu1 %v2928_v58  ;;  %3298 = vmatprep.subr.bf16.mxu1 %v3601_v60 }
 0x143   : > { %v3121_v1 = vpack.c.bf16 %v658_v0, %v656_v62  ;;  %v996_v2 = vmul.bf16 %v3119_v61, %v4134_v63  ;;  %v1652_v55 = vpop.permute.xlu0 %1651  ;;  %v3602_v61 = vld [vmem:[%s4007_s6 + $0x4] ss:$8 sps:$4 sm:$0xff]   ;;  %v3604_v62 = vld [vmem:[%s4007_s6 + $0x94] ss:$8 sps:$4 sm:$0xff]  }
 0x144   : > { %v1650_v54 = vpop.permute.xlu1 %1649  ;;  %v3606_v0 = vld [vmem:[%s4007_s6 + $0xa4] ss:$8 sps:$4 sm:$0xff]  }
 0x145   : > { %v998_v3 = vmul.bf16 %v3121_v1, %v4137_v56  ;;  %v3603_v1 = vld [vmem:[%s4007_s6 + $0x104] ss:$8 sps:$4 sm:$0xff]  }
 0x146   : > { %3446 = vmatprep.subr.bf16.mxu0 %v3603_v1 }
 0x147   : > { %v662_v5 = vpop.f32.mrb[20].mxu0  ;;  %v2932_v6 = vcombine.high %v996_v2, %v998_v3  ;;  %v2931_v7 = vcombine.low %v996_v2, %v998_v3  ;;  %v3607_v2 = vld [vmem:[%s4007_s6 + $0x24] ss:$8 sps:$4 sm:$0xff]   ;;  %v3609_v3 = vld [vmem:[%s4007_s6 + $0xb4] ss:$8 sps:$4 sm:$0xff]  }
 0x148   : > { %v664_v8 = vpop.f32.mrb[21].mxu0  ;;  %2983 = vmatmul.mubr.msk.bf16.vlgmr.msra.gmra.mrb[48].mxu0 %vm540_vm2, %v1640_v4  ;;  %v1654_v58 = vpop.permute.xlu1 %1653 }
 0x149   : > { %v3123_v9 = vpack.c.bf16 %v664_v8, %v662_v5  ;;  %v666_v10 = vpop.f32.mrb[22].mxu0  ;;  %1396 = vmatprep.mubr.bf16.mxu1 %v2932_v6  ;;  %1747 = vmatprep.mubr.bf16.mxu0 %v3739_v57  ;;  %v3611_v5 = vld [vmem:[%s4007_s6 + $0xc4] ss:$8 sps:$4 sm:$0xff]   ;;  %v3608_v6 = vld [vmem:[%s4007_s6 + $0x114] ss:$8 sps:$4 sm:$0xff]  }
 0x14a   : > { %v668_v16 = vpop.f32.mrb[23].mxu0  ;;  %1397 = vmatmul.mubr.bf16.gmra.mrb[32].mxu1 %v2931_v7  ;;  %3447 = vmatpush3.bf16.msra.mxu0 %v3603_v1  ;;  %v3612_v7 = vld [vmem:[%s4007_s6 + $0x44] ss:$8 sps:$4 sm:$0xff]   ;;  %v3614_v8 = vld [vmem:[%s4007_s6 + $0xd4] ss:$8 sps:$4 sm:$0xff]  }
 0x14b   : > { %v3125_v18 = vpack.c.bf16 %v668_v16, %v666_v10  ;;  %v1000_v19 = vmul.bf16 %v3123_v9, %v4144_v12  ;;  %3448 = vmatprep.subr.bf16.mxu0 %v3608_v6  ;;  %v3615_v9 = vld [vmem:[%s4007_s6 + $0x54] ss:$8 sps:$4 sm:$0xff]   ;;  %v3616_v10 = vld [vmem:[%s4007_s6 + $0xe4] ss:$8 sps:$4 sm:$0xff]  }
 0x14c   : > { %v3613_v16 = vld [vmem:[%s4007_s6 + $0x124] ss:$8 sps:$4 sm:$0xff]  }
 0x14d   : > { %v1002_v20 = vmul.bf16 %v3125_v18, %v4147_v17  ;;  %v3617_v18 = vld [vmem:[%s4007_s6 + $0x64] ss:$8 sps:$4 sm:$0xff]  }
 0x14e   : > { %3449 = vmatpush3.bf16.msra.mxu0 %v3608_v6 }
 0x14f   : > { %v672_v22 = vpop.f32.mrb[24].mxu0  ;;  %v2935_v23 = vcombine.high %v1000_v19, %v1002_v20  ;;  %v2934_v24 = vcombine.low %v1000_v19, %v1002_v20  ;;  %3450 = vmatprep.subr.bf16.mxu0 %v3613_v16  ;;  %v3619_v19 = vld [vmem:[%s4007_s6 + $0xf4] ss:$8 sps:$4 sm:$0xff]  }
 0x150   : > { %v674_v25 = vpop.f32.mrb[25].mxu0  ;;  %2984 = vmatmul.mubr.msk.bf16.gmra.mrb[52].mxu0 %vm540_vm2, %v1642_v21  ;;  %v3620_v20 = vld [vmem:[%s4007_s6 + $0x74] ss:$8 sps:$4 sm:$0xff]  }
 0x151   : > { %v3127_v26 = vpack.c.bf16 %v674_v25, %v672_v22  ;;  %v676_v27 = vpop.f32.mrb[26].mxu0  ;;  %1404 = vmatprep.mubr.bf16.mxu1 %v2935_v23  ;;  %1757 = vmatprep.mubr.bf16.mxu0 %v3739_v57  ;;  %v3621_v22 = vld [vmem:[%s4007_s6 + $0x144] ss:$8 sps:$4 sm:$0xff]   ;;  %v3622_v23 = vld [vmem:[%s4007_s6 + $0x154] ss:$8 sps:$4 sm:$0xff]  }
 0x152   : > { %v678_v29 = vpop.f32.mrb[27].mxu0  ;;  %1405 = vmatmul.mubr.bf16.gmra.mrb[36].mxu1 %v2934_v24  ;;  %3451 = vmatpush3.bf16.msra.mxu0 %v3613_v16  ;;  %v3623_v24 = vld [vmem:[%s4007_s6 + $0x164] ss:$8 sps:$4 sm:$0xff]   ;;  %v3624_v25 = vld [vmem:[%s4007_s6 + $0x174] ss:$8 sps:$4 sm:$0xff]  }
 0x153   : > { %v3129_v31 = vpack.c.bf16 %v678_v29, %v676_v27  ;;  %v1004_v32 = vmul.bf16 %v3127_v26, %v4154_v28 }
 0x155   : > { %v1006_v33 = vmul.bf16 %v3129_v31, %v4157_v30 }
 0x157   : > { %v682_v35 = vpop.f32.mrb[28].mxu0  ;;  %v2938_v36 = vcombine.high %v1004_v32, %v1006_v33  ;;  %v2937_v37 = vcombine.low %v1004_v32, %v1006_v33 }
 0x158   : > { %v684_v38 = vpop.f32.mrb[29].mxu0  ;;  %2985 = vmatmul.mubr.msk.bf16.gmra.mrb[56].mxu0 %vm540_vm2, %v1644_v34 }
 0x159   : > { %v3131_v39 = vpack.c.bf16 %v684_v38, %v682_v35  ;;  %v686_v59 = vpop.f32.mrb[30].mxu0  ;;  %1412 = vmatprep.mubr.bf16.mxu1 %v2938_v36  ;;  %1767 = vmatprep.mubr.bf16.mxu0 %v3739_v57 }
 0x15a   : > { %v688_v41 = vpop.f32.mrb[31].mxu0  ;;  %1413 = vmatmul.mubr.bf16.gmra.mrb[40].mxu1 %v2937_v37 }
 0x15b   : > { %v3133_v47 = vpack.c.bf16 %v688_v41, %v686_v59  ;;  %v1008_v48 = vmul.bf16 %v3131_v39, %v4164_v40 }
 0x15d   : > { %v1010_v49 = vmul.bf16 %v3133_v47, %v4167_v44 }
 0x15f   : > { %v2941_v51 = vcombine.high %v1008_v48, %v1010_v49  ;;  %v2940_v52 = vcombine.low %v1008_v48, %v1010_v49 }
 0x160   : > { %2986 = vmatmul.mubr.msk.bf16.gmra.mrb[60].mxu0 %vm540_vm2, %v1646_v50 }
 0x161   : > { %1420 = vmatprep.mubr.bf16.mxu1 %v2941_v51  ;;  %1777 = vmatprep.mubr.bf16.mxu0 %v3739_v57 }
 0x162   : > { %1421 = vmatmul.mubr.bf16.gmra.mrb[44].mxu1 %v2940_v52 }
 0x163   : > { %3430 = vmatprep.mubr.msk.bf16.mxu1 %vm540_vm2, %v1640_v4  ;;  %v3610_v4 = vld [vmem:[%s4007_s6 + $0x34] ss:$8 sps:$4 sm:$0xff]  }
 0x168   : > { %2987 = vmatmul.mubr.msk.bf16.gmra.mrb[64].mxu0 %vm540_vm2, %v1648_v53 }
 0x169   : > { %1787 = vmatprep.mubr.bf16.mxu0 %v3739_v57 }
 0x16a   : > { %3431 = vmatmul.mubr.msk.bf16.vlgmr.msra.gmra.mrb[48].mxu1 %vm540_vm2, %v1642_v21  ;;  %v3618_v21 = vld [vmem:[%s4007_s6 + $0x134] ss:$8 sps:$4 sm:$0xff]  }
 0x16b   : > { %3434 = vmatprep.mubr.msk.bf16.mxu1 %vm540_vm2, %v1644_v34  ;;  %3299 = vmatpush3.bf16.msra.mxu1 %v3602_v61 }
 0x16c   : > { %3300 = vmatprep.subr.bf16.mxu1 %v3604_v62  ;;  %3452 = vmatprep.subr.bf16.mxu0 %v3618_v21 }
 0x16d   : > { %3453 = vmatpush3.bf16.msra.mxu0 %v3618_v21 }
 0x16e   : > { %3454 = vmatprep.subr.bf16.mxu0 %v3621_v22 }
 0x170   : > { %2988 = vmatmul.mubr.msk.bf16.gmra.mrb[68].mxu0 %vm540_vm2, %v1650_v54 }
 0x171   : > { %1797 = vmatprep.mubr.bf16.mxu0 %v3739_v57  ;;  %3455 = vmatpush3.bf16.msra.mxu0 %v3621_v22 }
 0x172   : > { %3435 = vmatmul.mubr.msk.bf16.gmra.mrb[52].mxu1 %vm540_vm2, %v1646_v50  ;;  %3456 = vmatprep.subr.bf16.mxu0 %v3622_v23 }
 0x173   : > { %3438 = vmatprep.mubr.msk.bf16.mxu1 %vm540_vm2, %v1648_v53 }
 0x175   : > { %3457 = vmatpush3.bf16.msra.mxu0 %v3622_v23 }
 0x176   : > { %3458 = vmatprep.subr.bf16.mxu0 %v3623_v24 }
 0x178   : > { %2989 = vmatmul.mubr.msk.bf16.gmra.mrb[72].mxu0 %vm540_vm2, %v1652_v55 }
 0x179   : > { %1807 = vmatprep.mubr.bf16.mxu0 %v3739_v57  ;;  %v3605_v57 = vld [vmem:[%s4007_s6 + $0x14] ss:$8 sps:$4 sm:$0xff]   ;;  %3459 = vmatpush3.bf16.msra.mxu0 %v3623_v24  ;;  %s4215_s6 = scalar_lea.vmem [#allocation3], %s2865_s30 }
 0x17a   : > { %3439 = vmatmul.mubr.msk.bf16.gmra.mrb[56].mxu1 %vm540_vm2, %v1650_v54  ;;  %3460 = vmatprep.subr.bf16.mxu0 %v3624_v25  ;;  %s2750_s21 = sshll.u32 %s4215_s6, 4  ;;  %s4304_s21 = int_to_ptr.vmem [resolvable:$true] %s2750_s21 }
 0x17b   : > { %3442 = vmatprep.mubr.msk.bf16.mxu1 %vm540_vm2, %v1652_v55  ;;  %3301 = vmatpush3.bf16.msra.mxu1 %v3605_v57  ;;  %s3625_s8 = scalar_lea.vmem %s4304_s21, 2048 }
 0x17c   : > { %3302 = vmatprep.subr.bf16.mxu1 %v3606_v0  ;;  %p3626_p5 = scmp.ne.s32.totalorder %s4304_s21, %s3625_s8 }
 0x17d   : > { %3461 = vmatpush3.bf16.msra.mxu0 %v3624_v25 }
 0x17e   : > { %p3627_p6 = pnand %p3626_p5, %p3842_p7 }
 0x17f   : > { %3303 = vmatpush3.bf16.msra.mxu1 %v3607_v2 }
 0x180   : > { %2990 = vmatmul.mubr.msk.bf16.gmra.mrb[76].mxu0 %vm540_vm2, %v1654_v58  ;;  %3304 = vmatprep.subr.bf16.mxu1 %v3609_v3  ;;  %p3628_p8 = pneg %p3627_p6 }
 0x182   : > { %3443 = vmatmul.mubr.msk.bf16.gmra.mrb[60].mxu1 %vm540_vm2, %v1654_v58 }
 0x183   : > { %3305 = vmatpush3.bf16.msra.mxu1 %v3610_v4 }
 0x184   : > { %3306 = vmatprep.subr.bf16.mxu1 %v3611_v5 }
 0x187   : > { %3307 = vmatpush3.bf16.msra.mxu1 %v3612_v7 }
 0x188   : > { %3308 = vmatprep.subr.bf16.mxu1 %v3614_v8 }
 0x18b   : > { %3309 = vmatpush3.bf16.msra.mxu1 %v3615_v9 }
 0x18c   : > { %3310 = vmatprep.subr.bf16.mxu1 %v3616_v10 }
 0x18f   : > { %3311 = vmatpush3.bf16.msra.mxu1 %v3617_v18 }
 0x190   : > { %3312 = vmatprep.subr.bf16.mxu1 %v3619_v19 }
 0x193   : > { %3313 = vmatpush3.bf16.msra.mxu1 %v3620_v20 }
 0x1fb   : > { %v3414_v26 = vpop.f32.mrb[32].mxu0 }
 0x1fc   : > { %v1463_v27 = vpop.f32.mrb[33].mxu0 }
 0x1fd   : > { %v3225_v29 = vpop.f32.mrb[16].mxu1  ;;  %v3415_v31 = vpop.f32.mrb[34].mxu0 }
 0x1fe   : > { %v3226_v32 = vpop.f32.mrb[17].mxu1  ;;  %v1466_v33 = vpop.f32.mrb[35].mxu0 }
 0x1ff   : > { %v3227_v34 = vadd.f32 %v3226_v32, %v3225_v29  ;;  %v3228_v35 = vpop.f32.mrb[18].mxu1 }
 0x200   : > { %v3229_v36 = vpop.f32.mrb[19].mxu1 }
 0x201   : > { %v1464_v37 = vadd.f32 %v3227_v34, %v1463_v27  ;;  %v3230_v38 = vadd.f32 %v3229_v36, %v3228_v35 }
 0x203   : > { %v3135_v39 = vpack.c.bf16 %v1464_v37, %v1464_v37  ;;  %v1467_v59 = vadd.f32 %v3230_v38, %v1466_v33  ;;  %v3418_v41 = vpop.f32.mrb[36].mxu0 }
 0x204   : > { %v1479_v47 = vpop.f32.mrb[37].mxu0 }
 0x205   : > { %1590 = vst [vmem:[%s4215_s6] sm:$0xf] %v3135_v39  ;;  %v3136_v48 = vpack.c.bf16 %v1467_v59, %v1467_v59  ;;  %v3231_v49 = vpop.f32.mrb[20].mxu1  ;;  %v3419_v50 = vpop.f32.mrb[38].mxu0 }
 0x206   : > { %v3232_v51 = vpop.f32.mrb[21].mxu1  ;;  %v1482_v52 = vpop.f32.mrb[39].mxu0 }
 0x207   : > { %1591 = vst [vmem:[%s4215_s6 + $0x8] sm:$0xf] %v3136_v48  ;;  %v3233_v53 = vadd.f32 %v3232_v51, %v3231_v49  ;;  %v3234_v54 = vpop.f32.mrb[22].mxu1 }
 0x208   : > { %v3235_v55 = vpop.f32.mrb[23].mxu1 }
 0x209   : > { %v1472_v58 = vadd.f32 %v3414_v26, %v3233_v53  ;;  %v3236_v60 = vadd.f32 %v3235_v55, %v3234_v54 }
 0x20b   : > { %v3137_v61 = vpack.c.bf16 %v1472_v58, %v1472_v58  ;;  %v1475_v62 = vadd.f32 %v3415_v31, %v3236_v60  ;;  %v4219_v57 = vpop.f32.mrb[40].mxu0 }
 0x20c   : > { %v1495_v0 = vpop.f32.mrb[41].mxu0 }
 0x20d   : > { %1592 = vst [vmem:[%s4215_s6 + $0x10] sm:$0xf] %v3137_v61  ;;  %v3138_v1 = vpack.c.bf16 %v1475_v62, %v1475_v62  ;;  %v3237_v2 = vpop.f32.mrb[24].mxu1  ;;  %v4222_v3 = vpop.f32.mrb[42].mxu0 }
 0x20e   : > { %v3238_v4 = vpop.f32.mrb[25].mxu1  ;;  %v1498_v5 = vpop.f32.mrb[43].mxu0 }
 0x20f   : > { %1593 = vst [vmem:[%s4215_s6 + $0x18] sm:$0xf] %v3138_v1  ;;  %v3239_v6 = vadd.f32 %v3238_v4, %v3237_v2  ;;  %v3240_v7 = vpop.f32.mrb[26].mxu1 }
 0x210   : > { %v3241_v8 = vpop.f32.mrb[27].mxu1 }
 0x211   : > { %v1480_v9 = vadd.f32 %v3239_v6, %v1479_v47  ;;  %v3242_v10 = vadd.f32 %v3241_v8, %v3240_v7 }
 0x213   : > { %v3139_v16 = vpack.c.bf16 %v1480_v9, %v1480_v9  ;;  %v1483_v18 = vadd.f32 %v3242_v10, %v1482_v52  ;;  %v4225_v19 = vpop.f32.mrb[44].mxu0 }
 0x214   : > { %v4227_v20 = vpop.f32.mrb[45].mxu0 }
 0x215   : > { %1594 = vst [vmem:[%s4215_s6 + $0x20] sm:$0xf] %v3139_v16  ;;  %v3140_v21 = vpack.c.bf16 %v1483_v18, %v1483_v18  ;;  %v3243_v22 = vpop.f32.mrb[28].mxu1  ;;  %v4230_v23 = vpop.f32.mrb[46].mxu0 }
 0x216   : > { %v3244_v24 = vpop.f32.mrb[29].mxu1  ;;  %v4232_v25 = vpop.f32.mrb[47].mxu0 }
 0x217   : > { %1595 = vst [vmem:[%s4215_s6 + $0x28] sm:$0xf] %v3140_v21  ;;  %v3245_v26 = vadd.f32 %v3244_v24, %v3243_v22  ;;  %v3246_v27 = vpop.f32.mrb[30].mxu1 }
 0x218   : > { %v3247_v29 = vpop.f32.mrb[31].mxu1 }
 0x219   : > { %v1488_v31 = vadd.f32 %v3418_v41, %v3245_v26  ;;  %v3248_v32 = vadd.f32 %v3247_v29, %v3246_v27 }
 0x21b   : > { %v3141_v33 = vpack.c.bf16 %v1488_v31, %v1488_v31  ;;  %v1491_v34 = vadd.f32 %v3419_v50, %v3248_v32  ;;  %v1739_v35 = vpop.f32.mrb[48].mxu0 }
 0x21c   : > { %v1741_v36 = vpop.f32.mrb[49].mxu0 }
 0x21d   : > { %1596 = vst [vmem:[%s4215_s6 + $0x30] sm:$0xf] %v3141_v33  ;;  %v3142_v37 = vpack.c.bf16 %v1491_v34, %v1491_v34  ;;  %v3151_v38 = vpack.c.bf16 %v1741_v36, %v1739_v35  ;;  %v3249_v39 = vpop.f32.mrb[32].mxu1  ;;  %v1743_v59 = vpop.f32.mrb[50].mxu0 }
 0x21e   : > { %v3250_v47 = vpop.f32.mrb[33].mxu1  ;;  %v1745_v48 = vpop.f32.mrb[51].mxu0 }
 0x21f   : > { %1597 = vst [vmem:[%s4215_s6 + $0x38] sm:$0xf] %v3142_v37  ;;  %v3251_v49 = vadd.f32 %v3250_v47, %v3249_v39  ;;  %v3153_v51 = vpack.c.bf16 %v1745_v48, %v1743_v59  ;;  %v3252_v52 = vpop.f32.mrb[34].mxu1  ;;  %v2107_v41 = vmul.bf16 %v3151_v38, %v4087_v13 }
 0x220   : > { %v3253_v53 = vpop.f32.mrb[35].mxu1 }
 0x221   : > { %v1496_v54 = vadd.f32 %v3251_v49, %v1495_v0  ;;  %v2109_v50 = vmul.bf16 %v3153_v51, %v4090_v15  ;;  %v3254_v55 = vadd.f32 %v3253_v53, %v3252_v52 }
 0x223   : > { %v3143_v58 = vpack.c.bf16 %v1496_v54, %v1496_v54  ;;  %v3031_v60 = vcombine.low %v2107_v41, %v2109_v50  ;;  %v1499_v61 = vadd.f32 %v3254_v55, %v1498_v5  ;;  %v1749_v62 = vpop.f32.mrb[52].mxu0  ;;  %v3032_v1 = vcombine.high %v2107_v41, %v2109_v50 }
 0x224   : > { %v1751_v2 = vpop.f32.mrb[53].mxu0 }
 0x225   : > { %1598 = vst [vmem:[%s4215_s6 + $0x40] sm:$0xf] %v3143_v58  ;;  %v3144_v4 = vpack.c.bf16 %v1499_v61, %v1499_v61  ;;  %v3155_v6 = vpack.c.bf16 %v1751_v2, %v1749_v62  ;;  %v3255_v7 = vpop.f32.mrb[36].mxu1  ;;  %v1753_v8 = vpop.f32.mrb[54].mxu0  ;;  %2491 = vmatprep.mubr.bf16.mxu1 %v3032_v1 }
 0x226   : > { %v3256_v9 = vpop.f32.mrb[37].mxu1  ;;  %v1755_v10 = vpop.f32.mrb[55].mxu0  ;;  %2492 = vmatmul.mubr.bf16.vlgmr.msra.gmra.mrb[64].mxu1 %v3031_v60 }
 0x227   : > { %1599 = vst [vmem:[%s4215_s6 + $0x48] sm:$0xf] %v3144_v4  ;;  %v3257_v13 = vadd.f32 %v3256_v9, %v3255_v7  ;;  %v3157_v15 = vpack.c.bf16 %v1755_v10, %v1753_v8  ;;  %v3258_v0 = vpop.f32.mrb[38].mxu1  ;;  %v2111_v5 = vmul.bf16 %v3155_v6, %v4100_v43 }
 0x228   : > { %v3259_v16 = vpop.f32.mrb[39].mxu1 }
 0x229   : > { %v1504_v18 = vadd.f32 %v4219_v57, %v3257_v13  ;;  %v2113_v21 = vmul.bf16 %v3157_v15, %v4103_v45  ;;  %v3260_v22 = vadd.f32 %v3259_v16, %v3258_v0 }
 0x22b   : > { %v3145_v24 = vpack.c.bf16 %v1504_v18, %v1504_v18  ;;  %v1507_v26 = vadd.f32 %v4222_v3, %v3260_v22  ;;  %v1759_v27 = vpop.f32.mrb[56].mxu0  ;;  %v3035_v29 = vcombine.high %v2111_v5, %v2113_v21  ;;  %v3034_v31 = vcombine.low %v2111_v5, %v2113_v21 }
 0x22c   : > { %v1761_v32 = vpop.f32.mrb[57].mxu0 }
 0x22d   : > { %1600 = vst [vmem:[%s4215_s6 + $0x50] sm:$0xf] %v3145_v24  ;;  %v3146_v33 = vpack.c.bf16 %v1507_v26, %v1507_v26  ;;  %v3159_v34 = vpack.c.bf16 %v1761_v32, %v1759_v27  ;;  %v3261_v35 = vpop.f32.mrb[40].mxu1  ;;  %v1763_v36 = vpop.f32.mrb[58].mxu0  ;;  %2499 = vmatprep.mubr.bf16.mxu1 %v3035_v29  ;;  %v1946_v26 = vld [vmem:[%s4080_s29 + $0x2c] sm:$0xf] }
 0x22e   : > { %v3262_v43 = vpop.f32.mrb[41].mxu1  ;;  %v1765_v37 = vpop.f32.mrb[59].mxu0  ;;  %2500 = vmatmul.mubr.bf16.gmra.mrb[68].mxu1 %v3034_v31  ;;  %v1940_v27 = vld [vmem:[%s4080_s29 + $0x8] sm:$0xf]  ;;  %v1942_v32 = vld [vmem:[%s4080_s29 + $0x14] sm:$0xf] }
 0x22f   : > { %1601 = vst [vmem:[%s4215_s6 + $0x58] sm:$0xf] %v3146_v33  ;;  %v3263_v45 = vadd.f32 %v3262_v43, %v3261_v35  ;;  %v3161_v57 = vpack.c.bf16 %v1765_v37, %v1763_v36  ;;  %v3264_v38 = vpop.f32.mrb[42].mxu1  ;;  %v2115_v3 = vmul.bf16 %v3159_v34, %v4113_v11 }
 0x230   : > { %v3265_v39 = vpop.f32.mrb[43].mxu1 }
 0x231   : > { %v1512_v59 = vadd.f32 %v3263_v45, %v4227_v20  ;;  %v2117_v47 = vmul.bf16 %v3161_v57, %v4116_v14  ;;  %v3266_v48 = vadd.f32 %v3265_v39, %v3264_v38 }
 0x233   : > { %v3147_v49 = vpack.c.bf16 %v1512_v59, %v1512_v59  ;;  %v1515_v51 = vadd.f32 %v3266_v48, %v4232_v25  ;;  %v1769_v52 = vpop.f32.mrb[60].mxu0  ;;  %v3038_v53 = vcombine.high %v2115_v3, %v2117_v47  ;;  %v3037_v41 = vcombine.low %v2115_v3, %v2117_v47 }
 0x234   : > { %v1771_v54 = vpop.f32.mrb[61].mxu0 }
 0x235   : > { %1602 = vst [vmem:[%s4215_s6 + $0x60] sm:$0xf] %v3147_v49  ;;  %v3148_v50 = vpack.c.bf16 %v1515_v51, %v1515_v51  ;;  %v3163_v55 = vpack.c.bf16 %v1771_v54, %v1769_v52  ;;  %v3267_v58 = vpop.f32.mrb[44].mxu1  ;;  %v1773_v60 = vpop.f32.mrb[62].mxu0  ;;  %2507 = vmatprep.mubr.bf16.mxu1 %v3038_v53  ;;  %v1952_v53 = vld [vmem:[%s4080_s29 + $0x50] sm:$0xf] }
 0x236   : > { %v3268_v11 = vpop.f32.mrb[45].mxu1  ;;  %v1775_v61 = vpop.f32.mrb[63].mxu0  ;;  %2508 = vmatmul.mubr.bf16.gmra.mrb[72].mxu1 %v3037_v41 }
 0x237   : > { %1603 = vst [vmem:[%s4215_s6 + $0x68] sm:$0xf] %v3148_v50  ;;  %v3269_v14 = vadd.f32 %v3268_v11, %v3267_v58  ;;  %v3165_v20 = vpack.c.bf16 %v1775_v61, %v1773_v60  ;;  %v3270_v62 = vpop.f32.mrb[46].mxu1  ;;  %v2119_v25 = vmul.bf16 %v3163_v55, %v4125_v42  ;;  %v1954_v55 = vld [vmem:[%s4080_s29 + $0x5c] sm:$0xf] }
 0x238   : > { %v3271_v1 = vpop.f32.mrb[47].mxu1  ;;  %v1948_v58 = vld [vmem:[%s4080_s29 + $0x38] sm:$0xf]  ;;  %v1950_v61 = vld [vmem:[%s4080_s29 + $0x44] sm:$0xf] }
 0x239   : > { %v1520_v2 = vadd.f32 %v4225_v19, %v3269_v14  ;;  %v2121_v4 = vmul.bf16 %v3165_v20, %v4128_v46  ;;  %v3272_v6 = vadd.f32 %v3271_v1, %v3270_v62 }
 0x23b   : > { %v3149_v7 = vpack.c.bf16 %v1520_v2, %v1520_v2  ;;  %v1523_v8 = vadd.f32 %v4230_v23, %v3272_v6  ;;  %v1779_v9 = vpop.f32.mrb[64].mxu0  ;;  %v3041_v10 = vcombine.high %v2119_v25, %v2121_v4  ;;  %v3040_v13 = vcombine.low %v2119_v25, %v2121_v4  ;;  %v1944_v23 = vld [vmem:[%s4080_s29 + $0x20] sm:$0xf] }
 0x23c   : > { %v1781_v15 = vpop.f32.mrb[65].mxu0 }
 0x23d   : > { %1604 = vst [vmem:[%s4215_s6 + $0x70] sm:$0xf] %v3149_v7  ;;  %v3150_v0 = vpack.c.bf16 %v1523_v8, %v1523_v8  ;;  %v3167_v16 = vpack.c.bf16 %v1781_v15, %v1779_v9  ;;  %v1783_v42 = vpop.f32.mrb[66].mxu0  ;;  %v3432_v19 = vpop.f32.mrb[48].mxu1  ;;  %2515 = vmatprep.mubr.bf16.mxu1 %v3041_v10 }
 0x23e   : > { %v3156_v46 = vpack.c.bf16 %v3432_v19, %v3432_v19  ;;  %v1785_v5 = vpop.f32.mrb[67].mxu0  ;;  %v1852_v18 = vpop.f32.mrb[49].mxu1  ;;  %2516 = vmatmul.mubr.bf16.gmra.mrb[76].mxu1 %v3040_v13  ;;  %v1960_v19 = vld [vmem:[%s4080_s29 + $0x80] sm:$0xf] }
 0x23f   : > { %1605 = vst [vmem:[%s4215_s6 + $0x78] sm:$0xf] %v3150_v0  ;;  %v3169_v21 = vpack.c.bf16 %v1785_v5, %v1783_v42  ;;  %v3152_v22 = vpack.c.bf16 %v1852_v18, %v1852_v18  ;;  %v3433_v24 = vpop.f32.mrb[50].mxu1  ;;  %v2123_v33 = vmul.bf16 %v3167_v16, %v4134_v63 }
 0x240   : > { %v3158_v29 = vpack.c.bf16 %v3433_v24, %v3433_v24  ;;  %v1855_v31 = vpop.f32.mrb[51].mxu1  ;;  %v2112_v36 = vmul.bf16 %v3156_v46, %v1944_v23  ;;  %v1962_v23 = vld [vmem:[%s4080_s29 + $0x8c] sm:$0xf] }
 0x241   : > { %v2125_v34 = vmul.bf16 %v3169_v21, %v4137_v56  ;;  %v3154_v35 = vpack.c.bf16 %v1855_v31, %v1855_v31  ;;  %v2108_v37 = vmul.bf16 %v3152_v22, %v1940_v27  ;;  %v1956_v21 = vld [vmem:[%s4080_s29 + $0x68] sm:$0xf] }
 0x242   : > { %v2114_v43 = vmul.bf16 %v3158_v29, %v1946_v26  ;;  %v1958_v26 = vld [vmem:[%s4080_s29 + $0x74] sm:$0xf] }
 0x243   : > { %v2110_v45 = vmul.bf16 %v3154_v35, %v1942_v32  ;;  %v1789_v57 = vpop.f32.mrb[68].mxu0  ;;  %v3044_v38 = vcombine.high %v2123_v33, %v2125_v34  ;;  %v3043_v39 = vcombine.low %v2123_v33, %v2125_v34 }
 0x244   : > { %v3036_v3 = vcombine.low %v2112_v36, %v2114_v43  ;;  %v1791_v59 = vpop.f32.mrb[69].mxu0 }
 0x245   : > { %v3171_v47 = vpack.c.bf16 %v1791_v59, %v1789_v57  ;;  %v1793_v48 = vpop.f32.mrb[70].mxu0  ;;  %v3436_v49 = vpop.f32.mrb[52].mxu1  ;;  %2523 = vmatprep.mubr.bf16.mxu1 %v3044_v38  ;;  %v3033_v63 = vcombine.low %v2108_v37, %v2110_v45 }
 0x246   : > { %v3164_v56 = vpack.c.bf16 %v3436_v49, %v3436_v49  ;;  %v1795_v51 = vpop.f32.mrb[71].mxu0  ;;  %v1868_v52 = vpop.f32.mrb[53].mxu1  ;;  %2524 = vmatmul.mubr.bf16.gmra.mrb[80].mxu1 %v3043_v39 }
 0x247   : > { %v3173_v41 = vpack.c.bf16 %v1795_v51, %v1793_v48  ;;  %v3160_v54 = vpack.c.bf16 %v1868_v52, %v1868_v52  ;;  %v3437_v50 = vpop.f32.mrb[54].mxu1  ;;  %3462 = vmatprep.mubr.bf16.mxu0 %v3033_v63  ;;  %v2127_v14 = vmul.bf16 %v3171_v47, %v4144_v12  ;;  %v1968_v48 = vld [vmem:[%s4080_s29 + $0xb0] sm:$0xf]  ;;  %v1970_v51 = vld [vmem:[%s4080_s29 + $0xbc] sm:$0xf] }
 0x248   : > { %v3166_v60 = vpack.c.bf16 %v3437_v50, %v3437_v50  ;;  %v1871_v11 = vpop.f32.mrb[55].mxu1  ;;  %3463 = vmatmul.mubr.bf16.vlgmr.msra.gmra.mrb[80].mxu0 %v3036_v3  ;;  %v2120_v1 = vmul.bf16 %v3164_v56, %v1952_v53  ;;  %v1964_v52 = vld [vmem:[%s4080_s29 + $0x98] sm:$0xf] }
 0x249   : > { %v2129_v20 = vmul.bf16 %v3173_v41, %v4147_v17  ;;  %v3162_v62 = vpack.c.bf16 %v1871_v11, %v1871_v11  ;;  %v2116_v2 = vmul.bf16 %v3160_v54, %v1948_v58  ;;  %v1966_v54 = vld [vmem:[%s4080_s29 + $0xa4] sm:$0xf]  ;;  %s3741_s29 = smov [#allocation3]  }
 0x24a   : > { %v2122_v25 = vmul.bf16 %v3166_v60, %v1954_v55  ;;  %s3629_s30 = sshll.u32 %s3741_s29, 4  ;;  %s3630_s30 = int_to_ptr.vmem [resolvable:$false] %s3629_s30 }
 0x24b   : > { %v2118_v4 = vmul.bf16 %v3162_v62, %v1950_v61  ;;  %v1799_v6 = vpop.f32.mrb[72].mxu0  ;;  %v3047_v7 = vcombine.high %v2127_v14, %v2129_v20  ;;  %v3046_v8 = vcombine.low %v2127_v14, %v2129_v20  ;;  %s3631_s13 = scalar_lea.vmem %s3630_s30, 4096  ;;  %p3632_p9 = scmp.lt.s32.totalorder %s4304_s21, %s3630_s30 }
 0x24c   : > { %v1801_v9 = vpop.f32.mrb[73].mxu0  ;;  %v3042_v10 = vcombine.low %v2120_v1, %v2122_v25  ;;  %p3633_p10 = scmp.lt.s32.totalorder %s3631_s13, %s3625_s8 }
 0x24d   : > { %v3175_v13 = vpack.c.bf16 %v1801_v9, %v1799_v6  ;;  %v1803_v15 = vpop.f32.mrb[74].mxu0  ;;  %v3440_v0 = vpop.f32.mrb[56].mxu1  ;;  %2531 = vmatprep.mubr.bf16.mxu1 %v3047_v7  ;;  %v3039_v12 = vcombine.low %v2116_v2, %v2118_v4 }
 0x24e   : > { %v3172_v17 = vpack.c.bf16 %v3440_v0, %v3440_v0  ;;  %v1805_v16 = vpop.f32.mrb[75].mxu0  ;;  %v1884_v42 = vpop.f32.mrb[57].mxu1  ;;  %2532 = vmatmul.mubr.bf16.gmra.mrb[84].mxu1 %v3046_v8  ;;  %p3634_p11 = por %p3633_p10, %p3632_p9 }
 0x24f   : > { %v3177_v46 = vpack.c.bf16 %v1805_v16, %v1803_v15  ;;  %v3168_v5 = vpack.c.bf16 %v1884_v42, %v1884_v42  ;;  %v3441_v18 = vpop.f32.mrb[58].mxu1  ;;  %3466 = vmatprep.mubr.bf16.mxu0 %v3039_v12  ;;  %v2131_v27 = vmul.bf16 %v3175_v13, %v4154_v28 }
 0x250   : > { %v3174_v22 = vpack.c.bf16 %v3441_v18, %v3441_v18  ;;  %v1887_v24 = vpop.f32.mrb[59].mxu1  ;;  %3467 = vmatmul.mubr.bf16.gmra.mrb[84].mxu0 %v3042_v10  ;;  %v2128_v32 = vmul.bf16 %v3172_v17, %v1960_v19  ;;  %p3635_p13 = pnand %p3634_p11, %p3628_p8 }
 0x251   : > { %v2133_v29 = vmul.bf16 %v3177_v46, %v4157_v30  ;;  %v3170_v31 = vpack.c.bf16 %v1887_v24, %v1887_v24  ;;  %v2124_v34 = vmul.bf16 %v3168_v5, %v1956_v21 }
 0x252   : > { %v2130_v33 = vmul.bf16 %v3174_v22, %v1962_v23 }
 0x253   : > { %v2126_v35 = vmul.bf16 %v3170_v31, %v1958_v26  ;;  %v1809_v36 = vpop.f32.mrb[76].mxu0  ;;  %v3050_v43 = vcombine.high %v2131_v27, %v2133_v29  ;;  %v3049_v37 = vcombine.low %v2131_v27, %v2133_v29 }
 0x254   : > { %v1811_v45 = vpop.f32.mrb[77].mxu0  ;;  %v3048_v57 = vcombine.low %v2128_v32, %v2130_v33 }
 0x255   : > { %v3179_v38 = vpack.c.bf16 %v1811_v45, %v1809_v36  ;;  %v1813_v39 = vpop.f32.mrb[78].mxu0  ;;  %v3444_v3 = vpop.f32.mrb[60].mxu1  ;;  %2539 = vmatprep.mubr.bf16.mxu1 %v3050_v43  ;;  %v3045_v28 = vcombine.low %v2124_v34, %v2126_v35 }
 0x256   : > { %v3180_v30 = vpack.c.bf16 %v3444_v3, %v3444_v3  ;;  %v1815_v59 = vpop.f32.mrb[79].mxu0  ;;  %v1900_v47 = vpop.f32.mrb[61].mxu1  ;;  %2540 = vmatmul.mubr.bf16.gmra.mrb[88].mxu1 %v3049_v37 }
 0x257   : > { %v3181_v49 = vpack.c.bf16 %v1815_v59, %v1813_v39  ;;  %v3176_v63 = vpack.c.bf16 %v1900_v47, %v1900_v47  ;;  %v3445_v56 = vpop.f32.mrb[62].mxu1  ;;  %3470 = vmatprep.mubr.bf16.mxu0 %v3045_v28  ;;  %v2135_v50 = vmul.bf16 %v3179_v38, %v4164_v40 }
 0x258   : > { %v3182_v53 = vpack.c.bf16 %v3445_v56, %v3445_v56  ;;  %v1903_v41 = vpop.f32.mrb[63].mxu1  ;;  %3471 = vmatmul.mubr.bf16.gmra.mrb[88].mxu0 %v3048_v57  ;;  %v2136_v60 = vmul.bf16 %v3180_v30, %v1968_v48 }
 0x259   : > { %v2137_v55 = vmul.bf16 %v3181_v49, %v4167_v44  ;;  %v3178_v58 = vpack.c.bf16 %v1903_v41, %v1903_v41  ;;  %v2132_v61 = vmul.bf16 %v3176_v63, %v1964_v52 }
 0x25a   : > { %v2138_v11 = vmul.bf16 %v3182_v53, %v1970_v51 }
 0x25b   : > { %v2134_v14 = vmul.bf16 %v3178_v58, %v1966_v54  ;;  %v3053_v20 = vcombine.high %v2135_v50, %v2137_v55  ;;  %v3052_v62 = vcombine.low %v2135_v50, %v2137_v55 }
 0x25c   : > { %v3054_v1 = vcombine.low %v2136_v60, %v2138_v11 }
 0x25d   : > { %2547 = vmatprep.mubr.bf16.mxu1 %v3053_v20  ;;  %v3051_v25 = vcombine.low %v2132_v61, %v2134_v14 }
 0x25e   : > { %2548 = vmatmul.mubr.bf16.gmra.mrb[92].mxu1 %v3052_v62 }
 0x25f   : > { %3474 = vmatprep.mubr.bf16.mxu0 %v3051_v25 }
 0x260   : > { %3475 = vmatmul.mubr.bf16.gmra.mrb[92].mxu0 %v3054_v1 }
 0x2f9   : > { %v3314_v2 = vpop.f32.mrb[64].mxu1 }
 0x2fa   : > { %v3315_v4 = vpop.f32.mrb[65].mxu1 }
 0x2fb   : > { %v3316_v6 = vadd.f32 %v3315_v4, %v3314_v2  ;;  %v3317_v7 = vpop.f32.mrb[66].mxu1 }
 0x2fc   : > { %v3318_v40 = vpop.f32.mrb[67].mxu1 }
 0x2fd   : > { %v3319_v8 = vadd.f32 %v3318_v40, %v3317_v7 }
 0x301   : > { %v3320_v44 = vpop.f32.mrb[68].mxu1 }
 0x302   : > { %v3321_v9 = vpop.f32.mrb[69].mxu1 }
 0x303   : > { %v3322_v10 = vadd.f32 %v3321_v9, %v3320_v44  ;;  %v3323_v13 = vpop.f32.mrb[70].mxu1 }
 0x304   : > { %v3324_v15 = vpop.f32.mrb[71].mxu1 }
 0x305   : > { %v3325_v0 = vadd.f32 %v3324_v15, %v3323_v13 }
 0x309   : > { %v3326_v12 = vpop.f32.mrb[72].mxu1 }
 0x30a   : > { %v3327_v17 = vpop.f32.mrb[73].mxu1 }
 0x30b   : > { %v3328_v16 = vadd.f32 %v3327_v17, %v3326_v12  ;;  %v3329_v42 = vpop.f32.mrb[74].mxu1 }
 0x30c   : > { %v3330_v19 = vpop.f32.mrb[75].mxu1 }
 0x30d   : > { %v3331_v46 = vadd.f32 %v3330_v19, %v3329_v42 }
 0x311   : > { %v3332_v5 = vpop.f32.mrb[76].mxu1 }
 0x312   : > { %v3333_v18 = vpop.f32.mrb[77].mxu1 }
 0x313   : > { %v3334_v23 = vadd.f32 %v3333_v18, %v3332_v5  ;;  %v3335_v21 = vpop.f32.mrb[78].mxu1 }
 0x314   : > { %v3336_v22 = vpop.f32.mrb[79].mxu1 }
 0x315   : > { %v3337_v24 = vadd.f32 %v3336_v22, %v3335_v21 }
 0x319   : > { %v3338_v26 = vpop.f32.mrb[80].mxu1 }
 0x31a   : > { %v3339_v27 = vpop.f32.mrb[81].mxu1 }
 0x31b   : > { %v3340_v29 = vadd.f32 %v3339_v27, %v3338_v26  ;;  %v3341_v31 = vpop.f32.mrb[82].mxu1  ;;  %v3464_v32 = vpop.f32.mrb[80].mxu0 }
 0x31c   : > { %v2599_v33 = vadd.f32 %v3464_v32, %v3322_v10  ;;  %v3342_v34 = vpop.f32.mrb[83].mxu1  ;;  %v2590_v35 = vpop.f32.mrb[81].mxu0 }
 0x31d   : > { %v3343_v36 = vadd.f32 %v3342_v34, %v3341_v31  ;;  %v2591_v43 = vadd.f32 %v3316_v6, %v2590_v35  ;;  %v3465_v37 = vpop.f32.mrb[82].mxu0 }
 0x31e   : > { %v3185_v45 = vpack.c.bf16 %v2599_v33, %v2599_v33  ;;  %v2602_v57 = vadd.f32 %v3465_v37, %v3325_v0  ;;  %v2593_v38 = vpop.f32.mrb[83].mxu0 }
 0x31f   : > { %v3183_v39 = vpack.c.bf16 %v2591_v43, %v2591_v43  ;;  %v2594_v3 = vadd.f32 %v3319_v8, %v2593_v38 }
 0x320   : > { %2719 = vst [vmem:[%s4215_s6 + $0x14] sm:$0xf] %v3185_v45  ;;  %v3186_v28 = vpack.c.bf16 %v2602_v57, %v2602_v57 }
 0x321   : > { %2717 = vst [vmem:[%s4215_s6 + $0x4] sm:$0xf] %v3183_v39  ;;  %v3184_v30 = vpack.c.bf16 %v2594_v3, %v2594_v3  ;;  %v3344_v59 = vpop.f32.mrb[84].mxu1 }
 0x322   : > { %2720 = vst [vmem:[%s4215_s6 + $0x1c] sm:$0xf] %v3186_v28  ;;  %v3345_v47 = vpop.f32.mrb[85].mxu1 }
 0x323   : > { %2718 = vst [vmem:[%s4215_s6 + $0xc] sm:$0xf] %v3184_v30  ;;  %v3346_v48 = vadd.f32 %v3345_v47, %v3344_v59  ;;  %v3347_v49 = vpop.f32.mrb[86].mxu1  ;;  %v3468_v63 = vpop.f32.mrb[84].mxu0 }
 0x324   : > { %v2615_v56 = vadd.f32 %v3468_v63, %v3334_v23  ;;  %v3348_v51 = vpop.f32.mrb[87].mxu1  ;;  %v2606_v52 = vpop.f32.mrb[85].mxu0 }
 0x325   : > { %v3349_v53 = vadd.f32 %v3348_v51, %v3347_v49  ;;  %v2607_v41 = vadd.f32 %v3328_v16, %v2606_v52  ;;  %v3469_v54 = vpop.f32.mrb[86].mxu0 }
 0x326   : > { %v3189_v50 = vpack.c.bf16 %v2615_v56, %v2615_v56  ;;  %v2618_v55 = vadd.f32 %v3469_v54, %v3337_v24  ;;  %v2609_v58 = vpop.f32.mrb[87].mxu0 }
 0x327   : > { %v3187_v60 = vpack.c.bf16 %v2607_v41, %v2607_v41  ;;  %v2610_v11 = vadd.f32 %v3331_v46, %v2609_v58 }
 0x328   : > { %2723 = vst [vmem:[%s4215_s6 + $0x34] sm:$0xf] %v3189_v50  ;;  %v3190_v61 = vpack.c.bf16 %v2618_v55, %v2618_v55 }
 0x329   : > { %2721 = vst [vmem:[%s4215_s6 + $0x24] sm:$0xf] %v3187_v60  ;;  %v3188_v14 = vpack.c.bf16 %v2610_v11, %v2610_v11  ;;  %v3350_v20 = vpop.f32.mrb[88].mxu1 }
 0x32a   : > { %2724 = vst [vmem:[%s4215_s6 + $0x3c] sm:$0xf] %v3190_v61  ;;  %v3351_v62 = vpop.f32.mrb[89].mxu1 }
 0x32b   : > { %2722 = vst [vmem:[%s4215_s6 + $0x2c] sm:$0xf] %v3188_v14  ;;  %v3352_v1 = vadd.f32 %v3351_v62, %v3350_v20  ;;  %v3353_v25 = vpop.f32.mrb[90].mxu1  ;;  %v3472_v2 = vpop.f32.mrb[88].mxu0 }
 0x32c   : > { %v2631_v4 = vadd.f32 %v3472_v2, %v3346_v48  ;;  %v3354_v6 = vpop.f32.mrb[91].mxu1  ;;  %v2622_v7 = vpop.f32.mrb[89].mxu0 }
 0x32d   : > { %v3355_v40 = vadd.f32 %v3354_v6, %v3353_v25  ;;  %v2623_v8 = vadd.f32 %v3340_v29, %v2622_v7  ;;  %v3473_v44 = vpop.f32.mrb[90].mxu0 }
 0x32e   : > { %v3193_v9 = vpack.c.bf16 %v2631_v4, %v2631_v4  ;;  %v2634_v10 = vadd.f32 %v3473_v44, %v3349_v53  ;;  %v2625_v13 = vpop.f32.mrb[91].mxu0 }
 0x32f   : > { %v3191_v15 = vpack.c.bf16 %v2623_v8, %v2623_v8  ;;  %v2626_v0 = vadd.f32 %v3343_v36, %v2625_v13 }
 0x330   : > { %2727 = vst [vmem:[%s4215_s6 + $0x54] sm:$0xf] %v3193_v9  ;;  %v3194_v12 = vpack.c.bf16 %v2634_v10, %v2634_v10 }
 0x331   : > { %2725 = vst [vmem:[%s4215_s6 + $0x44] sm:$0xf] %v3191_v15  ;;  %v3192_v17 = vpack.c.bf16 %v2626_v0, %v2626_v0  ;;  %v3356_v16 = vpop.f32.mrb[92].mxu1 }
 0x332   : > { %2728 = vst [vmem:[%s4215_s6 + $0x5c] sm:$0xf] %v3194_v12  ;;  %v3357_v42 = vpop.f32.mrb[93].mxu1 }
 0x333   : > { %2726 = vst [vmem:[%s4215_s6 + $0x4c] sm:$0xf] %v3192_v17  ;;  %v3358_v19 = vadd.f32 %v3357_v42, %v3356_v16  ;;  %v3359_v46 = vpop.f32.mrb[94].mxu1  ;;  %v3476_v5 = vpop.f32.mrb[92].mxu0 }
 0x334   : > { %v3360_v18 = vpop.f32.mrb[95].mxu1  ;;  %v2638_v23 = vpop.f32.mrb[93].mxu0 }
 0x335   : > { %v2647_v21 = vadd.f32 %v3476_v5, %v3358_v19  ;;  %v3361_v22 = vadd.f32 %v3360_v18, %v3359_v46  ;;  %v2639_v24 = vadd.f32 %v3352_v1, %v2638_v23  ;;  %v3477_v26 = vpop.f32.mrb[94].mxu0 }
 0x336   : > { %v2641_v27 = vpop.f32.mrb[95].mxu0 }
 0x337   : > { %v3197_v29 = vpack.c.bf16 %v2647_v21, %v2647_v21  ;;  %v3195_v31 = vpack.c.bf16 %v2639_v24, %v2639_v24  ;;  %v2650_v32 = vadd.f32 %v3477_v26, %v3361_v22  ;;  %v2642_v33 = vadd.f32 %v3355_v40, %v2641_v27 }
 0x339   : > { %2731 = vst [vmem:[%s4215_s6 + $0x74] sm:$0xf] %v3197_v29  ;;  %2729 = vst [vmem:[%s4215_s6 + $0x64] sm:$0xf] %v3195_v31  ;;  %v3198_v34 = vpack.c.bf16 %v2650_v32, %v2650_v32  ;;  %v3196_v35 = vpack.c.bf16 %v2642_v33, %v2642_v33 }
 0x33b   : > { %2732 = vst [vmem:[%s4215_s6 + $0x7c] sm:$0xf] %v3198_v34  ;;  %2730 = vst [vmem:[%s4215_s6 + $0x6c] sm:$0xf] %v3196_v35 }
 0x33c   : > { %3638 = shalt.err (!%p3635_p13)
}
 0x33d   : > { %s3639_s18 = scalar_lea.hbm %s4302_s26, 2048  ;;  %s3643_s20 = scalar_lea.hbm %s4374_s4, 8192 }
 0x33e   : > { %p3640_p0 = scmp.ne.s32.totalorder %s4302_s26, %s3639_s18  ;;  %p3644_p3 = scmp.lt.u32.totalorder %s4302_s26, %s4374_s4 }
 0x33f   : > { %p3645_p4 = scmp.lt.u32.totalorder %s3643_s20, %s3639_s18  ;;  %p3647_p6 = scmp.lt.u32.totalorder %s3639_s18, %s4302_s26 }
 0x340   : > { %p3641_p1 = pnand %p3640_p0, %p3842_p7 }
 0x341   : > { %p3646_p5 = por %p3645_p4, %p3644_p3 }
 0x342   : > { %p3642_p2 = pneg %p3641_p1 }
 0x343   : > { %p3648_p8 = por %p3647_p6, %p3646_p5 }
 0x345   : > { %p3649_p9 = pnand %p3648_p8, %p3642_p2 }
 0x347   : > { %3652 = shalt.err (!%p3649_p9)
}
 0x348   : > { %s3742_s8 = smov 128   ;;  %s3743_s29 = smov 256  }
 0x349   : > { %s3744_s30 = smov 8  }
 0x34a   : > { %3481 = dma.vmem_to_hbm [thread:$0]  (%p3842_p7), %s4304_s21, 2048, %s4302_s26, %s4312_s5, %s3742_s8, %s3743_s29, %s3744_s30  }
 0x34b PF: > { %p3487_p10 = scmp.ge.s32.totalorder %s3735_s24, 2  ;;  %s2765_s13 = sand.u32 1, %s3699_s15  }
 0x34c   : > { %s2766_s18 = scalar_lea.sflag [#allocation4], %s2765_s13 }
 0x34d   : > { %p3484_p11 = pnand %p3487_p10, %p3850_p12 }
 0x34f   : > { %3694 = dma.done.wait (!%p3484_p11), %s2766_s18, 2048  }
 0x350   : > { %3696 = vsyncadd (!%p3484_p11), %s2766_s18, 4294965248  ;;  %s17_s24 = sadd.s32 1, %s3735_s24   ;;  %s4378_s15 = smov %s3703_s16 }
 0x351   : > { %p14_p13 = scmp.ge.s32.totalorder %s17_s24, 6   ;;  %s4379_s16 = smov %s3707_s17 }
 0x352   : > { %s4380_s17 = smov %s3858_s12  ;;  %s4381_s18 = smov %s3715_s19 }
 0x353   : > { %s4382_s19 = smov %s3855_s11  ;;  %s4383_s20 = smov %s3727_s22 }
 0x354   : > { %s4384_s21 = smov %s3731_s23  ;;  %s4385_s22 = smov %s4388_s27 }
 0x355   : > { %s4386_s23 = smov %s4392_s28  ;;  %16 = sbr.rel (!%p14_p13) target bundleno = 6 (0x6), region = 120 }
 0x35c   :  { %2771 = vsyncpa [#allocation4], 1 }
 0x35d   :  { %2773 = vsyncpa [#allocation4 + $0x1], 1 }

</bundles_post_ra>
